<compile_context>
chip_gen: v6e
topology: v6e:2x2x1
jax: 0.10.0
libtpu: 0.0.40
codegen_flags: <defaults>
</compile_context>

<pallas_src>
import jax
import jax.numpy as jnp
import numpy as np
from jax import lax
from jax.experimental import pallas as pl
from jax.experimental.pallas import tpu as pltpu


# ----------------------------------------------------------------------------
# Fused Pallas kernel: one-hot embedding gather + wavefront LSTM stack + FC
# + log-softmax over the time axis (dim=1 of the batch-first output)
# ----------------------------------------------------------------------------
def _make_fused_kernel(num_layers: int):
    def kernel(*refs):
        # ref layout (positional):
        #   [0]                        tok_col  VMEM (T*B, 1) int32, time-major
        #   [1]                        emb      VMEM (V, E)
        #   [2],[3],[4]                layer 0: wih0_t (E,4H), whh0_t (H,4H), b0 (1,4H)
        #   [5 .. 5+2*(L-1))           layers 1..L-1: wcat (2H,4H), b (1,4H)
        #   [5+2*(L-1)], [6+2*(L-1)]   fcw_t (H,O), fcb (1,O)
        #   [7+2*(L-1)]                out      VMEM (B, T*O) lane-dense
        tok_ref = refs[0]
        emb_ref = refs[1]
        wih0_ref, whh0_ref, b0_ref = refs[2], refs[3], refs[4]
        upper = refs[5:5 + 2 * (num_layers - 1)]
        fcw_ref = refs[5 + 2 * (num_layers - 1)]
        fcb_ref = refs[6 + 2 * (num_layers - 1)]
        out_ref = refs[7 + 2 * (num_layers - 1)]

        V, _E = emb_ref.shape
        H = whh0_ref.shape[0]
        O = fcw_ref.shape[1]
        B, TO = out_ref.shape
        T = TO // O
        TB = T * B

        # ---- 1) Embedding gather: one one-hot MXU matmul ---------------------
        # Rows are time-major (row r = t*B + b).  padding_idx row of the table
        # is already zero, so the one-hot product reproduces padding exactly.
        tok = tok_ref[...]                                        # (T*B, 1) int32
        vocab_iota = lax.broadcasted_iota(jnp.int32, (TB, V), 1)  # (T*B, V)
        onehot = (tok == vocab_iota).astype(jnp.float32)          # (T*B, V)
        x = jnp.dot(onehot, emb_ref[...],
                    preferred_element_type=jnp.float32)           # (T*B, E)

        # ---- 2) Layer-0 input projection hoisted out of the recurrence -------
        xw0 = jnp.dot(x, wih0_ref[...],
                      preferred_element_type=jnp.float32) + b0_ref[...]  # (T*B, 4H)

        # Hoisted weight loads (don't re-load inside the unrolled loop).
        whh0 = whh0_ref[...]                                      # (H, 4H)
        upper_w = [upper[2 * i][...] for i in range(num_layers - 1)]      # (2H, 4H)
        upper_b = [upper[2 * i + 1][...] for i in range(num_layers - 1)]  # (1, 4H)
        fcw = fcw_ref[...]                                        # (H, O)
        fcb = fcb_ref[...]                                        # (1, O)

        def lstm_cell(gates, c_prev):
            # One EUP pass over the full 4H-wide value each, then static
            # lane-aligned 32-lane slices (PyTorch gate order i, f, g, o).
            sg = jax.nn.sigmoid(gates)
            tg = jnp.tanh(gates)
            i_g = sg[:, 0:H]
            f_g = sg[:, H:2 * H]
            g_g = tg[:, 2 * H:3 * H]
            o_g = sg[:, 3 * H:4 * H]
            c_new = f_g * c_prev + i_g * g_g
            h_new = o_g * jnp.tanh(c_new)
            return h_new, c_new

        h = [jnp.zeros((B, H), jnp.float32) for _ in range(num_layers)]
        c = [jnp.zeros((B, H), jnp.float32) for _ in range(num_layers)]
        d_steps = []

        # ---- 3) Wavefront-interleaved recurrence (fully unrolled, static T) --
        for t in range(T):
            # layer 0: hoisted xw0 slice + recurrent matmul
            gates0 = xw0[t * B:(t + 1) * B, :] + jnp.dot(
                h[0], whh0, preferred_element_type=jnp.float32)   # (B, 4H)
            h[0], c[0] = lstm_cell(gates0, c[0])
            inp = h[0]
            # layers 1..L-1: folded input+recurrent matmul (one MXU op/step)
            for l in range(1, num_layers):
                xh = jnp.concatenate([inp, h[l]], axis=1)         # (B, 2H)
                gates = jnp.dot(xh, upper_w[l - 1],
                                preferred_element_type=jnp.float32) + upper_b[l - 1]
                h[l], c[l] = lstm_cell(gates, c[l])
                inp = h[l]
            # per-step FC projection (overlaps next step's layer-0 matmul)
            d_steps.append(jnp.dot(inp, fcw,
                                   preferred_element_type=jnp.float32) + fcb)  # (B, O)
            # nn.LSTM inter-layer dropout is identity at inference time.

        # ---- 4) log-softmax over the time axis + single 128-lane store -------
        m = d_steps[0]
        for t in range(1, T):
            m = jnp.maximum(m, d_steps[t])
        s = jnp.zeros_like(m)
        for t in range(T):
            s = s + jnp.exp(d_steps[t] - m)
        log_z = m + jnp.log(s)                                    # (B, O)
        # Lane-dense result: lanes of row b laid out as t*O + o.
        out_ref[...] = jnp.concatenate(
            [d_steps[t] - log_z for t in range(T)], axis=1)       # (B, T*O)

    return kernel


# ----------------------------------------------------------------------------
# Wrapper: one-time weight prep + a single jitted pallas_call
# ----------------------------------------------------------------------------
def prepare_kernel_params(params):
    """Pre-transpose weights, fuse biases, fold layer>=1 [wih; whh] blocks."""
    layers = params["lstm"]
    l0 = layers[0]
    kp = {
        "emb": params["embedding"],                              # (V, E) — no reshape
        "wih0_t": jnp.transpose(l0["w_ih"]),                     # (E, 4H)
        "whh0_t": jnp.transpose(l0["w_hh"]),                     # (H, 4H)
        "b0": (l0["b_ih"] + l0["b_hh"]).reshape(1, -1),          # (1, 4H)
        "wcat": [],                                              # per upper layer (2H, 4H)
        "bu": [],                                                # per upper layer (1, 4H)
        "fcw_t": jnp.transpose(params["fc_w"]),                  # (H, O)
        "fcb": params["fc_b"].reshape(1, -1),                    # (1, O)
    }
    for layer in layers[1:]:
        kp["wcat"].append(jnp.concatenate(
            [jnp.transpose(layer["w_ih"]), jnp.transpose(layer["w_hh"])], axis=0))
        kp["bu"].append((layer["b_ih"] + layer["b_hh"]).reshape(1, -1))
    return kp


@jax.jit
def rnn_pos_tagger_forward(tokens, kp):
    """tokens: (B, T) int32.  Returns log-probs (B, T, O), log-softmax over dim=1."""
    B, T = tokens.shape
    O = kp["fcb"].shape[1]
    num_layers = 1 + len(kp["wcat"])

    # Time-major token column for the in-kernel one-hot gather: row r = t*B + b.
    tok_col = jnp.transpose(tokens).reshape(T * B, 1).astype(jnp.int32)

    flat_upper = []
    for w, b in zip(kp["wcat"], kp["bu"]):
        flat_upper += [w, b]
    args = [tok_col, kp["emb"], kp["wih0_t"], kp["whh0_t"], kp["b0"],
            *flat_upper, kp["fcw_t"], kp["fcb"]]

    vmem = pl.BlockSpec(memory_space=pltpu.MemorySpace.VMEM)
    out2d = pl.pallas_call(
        _make_fused_kernel(num_layers),
        out_shape=jax.ShapeDtypeStruct((B, T * O), jnp.float32),  # lane-dense (2, 128)
        in_specs=[vmem] * len(args),
        out_specs=vmem,
    )(*args)
    return out2d.reshape(B, T, O)

    # Note: the PyTorch forward also computes torch.cat((hidden[-1], hidden[0]), dim=1)
    # but never uses it for the returned value, so it is omitted here.


# ----------------------------------------------------------------------------
# Pure-JAX reference (for correctness check)
# ----------------------------------------------------------------------------
def lstm_layer_ref(x_bte, w_ih, w_hh, b_ih, b_hh):
    B, T, E = x_bte.shape
    H = w_hh.shape[1]
    b = b_ih + b_hh

    def step(carry, x_t):
        h, c = carry
        gates = x_t @ w_ih.T + h @ w_hh.T + b
        i_g = jax.nn.sigmoid(gates[:, :H])
        f_g = jax.nn.sigmoid(gates[:, H:2 * H])
        g_g = jnp.tanh(gates[:, 2 * H:3 * H])
        o_g = jax.nn.sigmoid(gates[:, 3 * H:])
        c = f_g * c + i_g * g_g
        h = o_g * jnp.tanh(c)
        return (h, c), h

    init = (jnp.zeros((B, H), jnp.float32), jnp.zeros((B, H), jnp.float32))
    _, out = lax.scan(step, init, jnp.transpose(x_bte, (1, 0, 2)))
    return jnp.transpose(out, (1, 0, 2))


def reference_forward(tokens, params):
    emb = jnp.take(params["embedding"], tokens, axis=0)
    x = emb
    for layer in params["lstm"]:
        x = lstm_layer_ref(x, layer["w_ih"], layer["w_hh"],
                           layer["b_ih"], layer["b_hh"])
    dense = x @ params["fc_w"].T + params["fc_b"]             # (B, T, O)
    return jax.nn.log_softmax(dense, axis=1)                  # over dim=1 (time axis)


# ----------------------------------------------------------------------------
# Parameter init + main
# ----------------------------------------------------------------------------
def init_params(key, vocab_size, embed_dim, hidden_dim, num_layers, output_dim):
    keys = jax.random.split(key, 3 + 4 * num_layers)
    k = iter(keys)
    emb = 0.1 * jax.random.normal(next(k), (vocab_size, embed_dim), jnp.float32)
    emb = emb.at[45].set(0.0)  # padding_idx=45 row is zero
    lstm_layers = []
    in_dim = embed_dim
    for _ in range(num_layers):
        w_ih = 0.1 * jax.random.normal(next(k), (4 * hidden_dim, in_dim), jnp.float32)
        w_hh = 0.1 * jax.random.normal(next(k), (4 * hidden_dim, hidden_dim), jnp.float32)
        b_ih = 0.1 * jax.random.normal(next(k), (4 * hidden_dim,), jnp.float32)
        b_hh = 0.1 * jax.random.normal(next(k), (4 * hidden_dim,), jnp.float32)
        lstm_layers.append({"w_ih": w_ih, "w_hh": w_hh, "b_ih": b_ih, "b_hh": b_hh})
        in_dim = hidden_dim
    fc_w = 0.1 * jax.random.normal(next(k), (output_dim, hidden_dim), jnp.float32)
    fc_b = 0.1 * jax.random.normal(next(k), (output_dim,), jnp.float32)
    return {"embedding": emb, "lstm": lstm_layers, "fc_w": fc_w, "fc_b": fc_b}


if __name__ == "__main__":
    # module hyper-params: embedding_dim=32, vocab=64, hidden=32, layers=2,
    # dropout=0.5 (inactive at inference), output_dim=16
    B, T = 2, 8
    V, E, H, L, O = 64, 32, 32, 2, 16

    key = jax.random.PRNGKey(0)
    k_par, k_tok = jax.random.split(key)
    params = init_params(k_par, V, E, H, L, O)
    kparams = prepare_kernel_params(params)          # one-time weight prep
    tokens = jax.random.randint(k_tok, (B, T), 0, V, dtype=jnp.int32)

    out = rnn_pos_tagger_forward(tokens, kparams)
    out = jax.block_until_ready(out)

    ref = jax.block_until_ready(reference_forward(tokens, params))
    np.testing.assert_allclose(np.asarray(out), np.asarray(ref), rtol=1e-5, atol=1e-5)

    assert out.shape == (B, T, O) and out.dtype == jnp.float32
    print("KERNEL_OK")
</pallas_src>

<mosaic_0001>
module attributes {stable_mosaic.version = 11 : i64} {
  func.func @kernel(%arg0: memref<16x1xi32, #tpu.memory_space<vmem>>, %arg1: memref<64x32xf32, #tpu.memory_space<vmem>>, %arg2: memref<32x128xf32, #tpu.memory_space<vmem>>, %arg3: memref<32x128xf32, #tpu.memory_space<vmem>>, %arg4: memref<1x128xf32, #tpu.memory_space<vmem>>, %arg5: memref<64x128xf32, #tpu.memory_space<vmem>>, %arg6: memref<1x128xf32, #tpu.memory_space<vmem>>, %arg7: memref<32x16xf32, #tpu.memory_space<vmem>>, %arg8: memref<1x16xf32, #tpu.memory_space<vmem>>, %arg9: memref<2x128xf32, #tpu.memory_space<vmem>>) attributes {dimension_semantics = [], scalar_prefetch = 0 : i64, scratch_operands = 0 : i64, tpu.core_type = #tpu.core_type<tc>} {
    %c0 = arith.constant 0 : index
    %c0_0 = arith.constant 0 : index
    %0 = vector.load %arg0[%c0, %c0_0] : memref<16x1xi32, #tpu.memory_space<vmem>>, vector<16x1xi32>
    %1 = tpu.iota {dimensions = array<i32: 1>} : vector<16x64xi32>
    %2 = vector.broadcast %0 : vector<16x1xi32> to vector<16x64xi32>
    %3 = arith.cmpi eq, %2, %1 : vector<16x64xi32>
    %4 = arith.extui %3 : vector<16x64xi1> to vector<16x64xi32>
    %5 = arith.sitofp %4 : vector<16x64xi32> to vector<16x64xf32>
    %c0_1 = arith.constant 0 : index
    %c0_2 = arith.constant 0 : index
    %6 = vector.load %arg1[%c0_1, %c0_2] : memref<64x32xf32, #tpu.memory_space<vmem>>, vector<64x32xf32>
    %cst = arith.constant dense<0.000000e+00> : vector<16x32xf32>
    %7 = tpu.matmul %5, %6, %cst {dimension_numbers = #tpu.dot_dimension_numbers<[1], [0], [0], [1], [0, 0, 1, 1], [], []>} : vector<16x64xf32>, vector<64x32xf32>, vector<16x32xf32> -> vector<16x32xf32>
    %c0_3 = arith.constant 0 : index
    %c0_4 = arith.constant 0 : index
    %8 = vector.load %arg2[%c0_3, %c0_4] : memref<32x128xf32, #tpu.memory_space<vmem>>, vector<32x128xf32>
    %cst_5 = arith.constant dense<0.000000e+00> : vector<16x128xf32>
    %9 = tpu.matmul %7, %8, %cst_5 {dimension_numbers = #tpu.dot_dimension_numbers<[1], [0], [0], [1], [0, 0, 1, 1], [], []>} : vector<16x32xf32>, vector<32x128xf32>, vector<16x128xf32> -> vector<16x128xf32>
    %c0_6 = arith.constant 0 : index
    %c0_7 = arith.constant 0 : index
    %10 = vector.load %arg4[%c0_6, %c0_7] : memref<1x128xf32, #tpu.memory_space<vmem>>, vector<1x128xf32>
    %11 = vector.broadcast %10 : vector<1x128xf32> to vector<16x128xf32>
    %12 = arith.addf %9, %11 : vector<16x128xf32>
    %c0_8 = arith.constant 0 : index
    %c0_9 = arith.constant 0 : index
    %13 = vector.load %arg3[%c0_8, %c0_9] : memref<32x128xf32, #tpu.memory_space<vmem>>, vector<32x128xf32>
    %c0_10 = arith.constant 0 : index
    %c0_11 = arith.constant 0 : index
    %14 = vector.load %arg5[%c0_10, %c0_11] : memref<64x128xf32, #tpu.memory_space<vmem>>, vector<64x128xf32>
    %c0_12 = arith.constant 0 : index
    %c0_13 = arith.constant 0 : index
    %15 = vector.load %arg6[%c0_12, %c0_13] : memref<1x128xf32, #tpu.memory_space<vmem>>, vector<1x128xf32>
    %c0_14 = arith.constant 0 : index
    %c0_15 = arith.constant 0 : index
    %16 = vector.load %arg7[%c0_14, %c0_15] : memref<32x16xf32, #tpu.memory_space<vmem>>, vector<32x16xf32>
    %c0_16 = arith.constant 0 : index
    %c0_17 = arith.constant 0 : index
    %17 = vector.load %arg8[%c0_16, %c0_17] : memref<1x16xf32, #tpu.memory_space<vmem>>, vector<1x16xf32>
    %cst_18 = arith.constant 0.000000e+00 : f32
    %18 = vector.broadcast %cst_18 : f32 to vector<2x32xf32>
    %cst_19 = arith.constant 0.000000e+00 : f32
    %19 = vector.broadcast %cst_19 : f32 to vector<2x32xf32>
    %cst_20 = arith.constant 0.000000e+00 : f32
    %20 = vector.broadcast %cst_20 : f32 to vector<2x32xf32>
    %cst_21 = arith.constant 0.000000e+00 : f32
    %21 = vector.broadcast %cst_21 : f32 to vector<2x32xf32>
    %22 = vector.extract_strided_slice %12 {offsets = [0, 0], sizes = [2, 128], strides = [1, 1]} : vector<16x128xf32> to vector<2x128xf32>
    %cst_22 = arith.constant dense<0.000000e+00> : vector<2x128xf32>
    %23 = tpu.matmul %18, %13, %cst_22 {dimension_numbers = #tpu.dot_dimension_numbers<[1], [0], [0], [1], [0, 0, 1, 1], [], []>} : vector<2x32xf32>, vector<32x128xf32>, vector<2x128xf32> -> vector<2x128xf32>
    %24 = arith.addf %22, %23 : vector<2x128xf32>
    %25 = arith.negf %24 : vector<2x128xf32>
    %26 = math.exp %25 : vector<2x128xf32>
    %cst_23 = arith.constant 1.000000e+00 : f32
    %27 = vector.broadcast %cst_23 : f32 to vector<2x128xf32>
    %28 = arith.addf %27, %26 : vector<2x128xf32>
    %29 = arith.divf %27, %28 : vector<2x128xf32>
    %30 = math.tanh %24 : vector<2x128xf32>
    %31 = vector.extract_strided_slice %29 {offsets = [0, 0], sizes = [2, 32], strides = [1, 1]} : vector<2x128xf32> to vector<2x32xf32>
    %32 = vector.extract_strided_slice %29 {offsets = [0, 32], sizes = [2, 32], strides = [1, 1]} : vector<2x128xf32> to vector<2x32xf32>
    %33 = vector.extract_strided_slice %30 {offsets = [0, 64], sizes = [2, 32], strides = [1, 1]} : vector<2x128xf32> to vector<2x32xf32>
    %34 = vector.extract_strided_slice %29 {offsets = [0, 96], sizes = [2, 32], strides = [1, 1]} : vector<2x128xf32> to vector<2x32xf32>
    %35 = arith.mulf %32, %20 : vector<2x32xf32>
    %36 = arith.mulf %31, %33 : vector<2x32xf32>
    %37 = arith.addf %35, %36 : vector<2x32xf32>
    %38 = math.tanh %37 : vector<2x32xf32>
    %39 = arith.mulf %34, %38 : vector<2x32xf32>
    %40 = tpu.concatenate %39, %19 in 1 : vector<2x32xf32>, vector<2x32xf32> -> vector<2x64xf32>
    %cst_24 = arith.constant dense<0.000000e+00> : vector<2x128xf32>
    %41 = tpu.matmul %40, %14, %cst_24 {dimension_numbers = #tpu.dot_dimension_numbers<[1], [0], [0], [1], [0, 0, 1, 1], [], []>} : vector<2x64xf32>, vector<64x128xf32>, vector<2x128xf32> -> vector<2x128xf32>
    %42 = vector.broadcast %15 : vector<1x128xf32> to vector<2x128xf32>
    %43 = arith.addf %41, %42 : vector<2x128xf32>
    %44 = arith.negf %43 : vector<2x128xf32>
    %45 = math.exp %44 : vector<2x128xf32>
    %cst_25 = arith.constant 1.000000e+00 : f32
    %46 = vector.broadcast %cst_25 : f32 to vector<2x128xf32>
    %47 = arith.addf %46, %45 : vector<2x128xf32>
    %48 = arith.divf %46, %47 : vector<2x128xf32>
    %49 = math.tanh %43 : vector<2x128xf32>
    %50 = vector.extract_strided_slice %48 {offsets = [0, 0], sizes = [2, 32], strides = [1, 1]} : vector<2x128xf32> to vector<2x32xf32>
    %51 = vector.extract_strided_slice %48 {offsets = [0, 32], sizes = [2, 32], strides = [1, 1]} : vector<2x128xf32> to vector<2x32xf32>
    %52 = vector.extract_strided_slice %49 {offsets = [0, 64], sizes = [2, 32], strides = [1, 1]} : vector<2x128xf32> to vector<2x32xf32>
    %53 = vector.extract_strided_slice %48 {offsets = [0, 96], sizes = [2, 32], strides = [1, 1]} : vector<2x128xf32> to vector<2x32xf32>
    %54 = arith.mulf %51, %21 : vector<2x32xf32>
    %55 = arith.mulf %50, %52 : vector<2x32xf32>
    %56 = arith.addf %54, %55 : vector<2x32xf32>
    %57 = math.tanh %56 : vector<2x32xf32>
    %58 = arith.mulf %53, %57 : vector<2x32xf32>
    %cst_26 = arith.constant dense<0.000000e+00> : vector<2x16xf32>
    %59 = tpu.matmul %58, %16, %cst_26 {dimension_numbers = #tpu.dot_dimension_numbers<[1], [0], [0], [1], [0, 0, 1, 1], [], []>} : vector<2x32xf32>, vector<32x16xf32>, vector<2x16xf32> -> vector<2x16xf32>
    %60 = vector.broadcast %17 : vector<1x16xf32> to vector<2x16xf32>
    %61 = arith.addf %59, %60 : vector<2x16xf32>
    %62 = vector.extract_strided_slice %12 {offsets = [2, 0], sizes = [2, 128], strides = [1, 1]} : vector<16x128xf32> to vector<2x128xf32>
    %cst_27 = arith.constant dense<0.000000e+00> : vector<2x128xf32>
    %63 = tpu.matmul %39, %13, %cst_27 {dimension_numbers = #tpu.dot_dimension_numbers<[1], [0], [0], [1], [0, 0, 1, 1], [], []>} : vector<2x32xf32>, vector<32x128xf32>, vector<2x128xf32> -> vector<2x128xf32>
    %64 = arith.addf %62, %63 : vector<2x128xf32>
    %65 = arith.negf %64 : vector<2x128xf32>
    %66 = math.exp %65 : vector<2x128xf32>
    %cst_28 = arith.constant 1.000000e+00 : f32
    %67 = vector.broadcast %cst_28 : f32 to vector<2x128xf32>
    %68 = arith.addf %67, %66 : vector<2x128xf32>
    %69 = arith.divf %67, %68 : vector<2x128xf32>
    %70 = math.tanh %64 : vector<2x128xf32>
    %71 = vector.extract_strided_slice %69 {offsets = [0, 0], sizes = [2, 32], strides = [1, 1]} : vector<2x128xf32> to vector<2x32xf32>
    %72 = vector.extract_strided_slice %69 {offsets = [0, 32], sizes = [2, 32], strides = [1, 1]} : vector<2x128xf32> to vector<2x32xf32>
    %73 = vector.extract_strided_slice %70 {offsets = [0, 64], sizes = [2, 32], strides = [1, 1]} : vector<2x128xf32> to vector<2x32xf32>
    %74 = vector.extract_strided_slice %69 {offsets = [0, 96], sizes = [2, 32], strides = [1, 1]} : vector<2x128xf32> to vector<2x32xf32>
    %75 = arith.mulf %72, %37 : vector<2x32xf32>
    %76 = arith.mulf %71, %73 : vector<2x32xf32>
    %77 = arith.addf %75, %76 : vector<2x32xf32>
    %78 = math.tanh %77 : vector<2x32xf32>
    %79 = arith.mulf %74, %78 : vector<2x32xf32>
    %80 = tpu.concatenate %79, %58 in 1 : vector<2x32xf32>, vector<2x32xf32> -> vector<2x64xf32>
    %cst_29 = arith.constant dense<0.000000e+00> : vector<2x128xf32>
    %81 = tpu.matmul %80, %14, %cst_29 {dimension_numbers = #tpu.dot_dimension_numbers<[1], [0], [0], [1], [0, 0, 1, 1], [], []>} : vector<2x64xf32>, vector<64x128xf32>, vector<2x128xf32> -> vector<2x128xf32>
    %82 = vector.broadcast %15 : vector<1x128xf32> to vector<2x128xf32>
    %83 = arith.addf %81, %82 : vector<2x128xf32>
    %84 = arith.negf %83 : vector<2x128xf32>
    %85 = math.exp %84 : vector<2x128xf32>
    %cst_30 = arith.constant 1.000000e+00 : f32
    %86 = vector.broadcast %cst_30 : f32 to vector<2x128xf32>
    %87 = arith.addf %86, %85 : vector<2x128xf32>
    %88 = arith.divf %86, %87 : vector<2x128xf32>
    %89 = math.tanh %83 : vector<2x128xf32>
    %90 = vector.extract_strided_slice %88 {offsets = [0, 0], sizes = [2, 32], strides = [1, 1]} : vector<2x128xf32> to vector<2x32xf32>
    %91 = vector.extract_strided_slice %88 {offsets = [0, 32], sizes = [2, 32], strides = [1, 1]} : vector<2x128xf32> to vector<2x32xf32>
    %92 = vector.extract_strided_slice %89 {offsets = [0, 64], sizes = [2, 32], strides = [1, 1]} : vector<2x128xf32> to vector<2x32xf32>
    %93 = vector.extract_strided_slice %88 {offsets = [0, 96], sizes = [2, 32], strides = [1, 1]} : vector<2x128xf32> to vector<2x32xf32>
    %94 = arith.mulf %91, %56 : vector<2x32xf32>
    %95 = arith.mulf %90, %92 : vector<2x32xf32>
    %96 = arith.addf %94, %95 : vector<2x32xf32>
    %97 = math.tanh %96 : vector<2x32xf32>
    %98 = arith.mulf %93, %97 : vector<2x32xf32>
    %cst_31 = arith.constant dense<0.000000e+00> : vector<2x16xf32>
    %99 = tpu.matmul %98, %16, %cst_31 {dimension_numbers = #tpu.dot_dimension_numbers<[1], [0], [0], [1], [0, 0, 1, 1], [], []>} : vector<2x32xf32>, vector<32x16xf32>, vector<2x16xf32> -> vector<2x16xf32>
    %100 = vector.broadcast %17 : vector<1x16xf32> to vector<2x16xf32>
    %101 = arith.addf %99, %100 : vector<2x16xf32>
    %102 = vector.extract_strided_slice %12 {offsets = [4, 0], sizes = [2, 128], strides = [1, 1]} : vector<16x128xf32> to vector<2x128xf32>
    %cst_32 = arith.constant dense<0.000000e+00> : vector<2x128xf32>
    %103 = tpu.matmul %79, %13, %cst_32 {dimension_numbers = #tpu.dot_dimension_numbers<[1], [0], [0], [1], [0, 0, 1, 1], [], []>} : vector<2x32xf32>, vector<32x128xf32>, vector<2x128xf32> -> vector<2x128xf32>
    %104 = arith.addf %102, %103 : vector<2x128xf32>
    %105 = arith.negf %104 : vector<2x128xf32>
    %106 = math.exp %105 : vector<2x128xf32>
    %cst_33 = arith.constant 1.000000e+00 : f32
    %107 = vector.broadcast %cst_33 : f32 to vector<2x128xf32>
    %108 = arith.addf %107, %106 : vector<2x128xf32>
    %109 = arith.divf %107, %108 : vector<2x128xf32>
    %110 = math.tanh %104 : vector<2x128xf32>
    %111 = vector.extract_strided_slice %109 {offsets = [0, 0], sizes = [2, 32], strides = [1, 1]} : vector<2x128xf32> to vector<2x32xf32>
    %112 = vector.extract_strided_slice %109 {offsets = [0, 32], sizes = [2, 32], strides = [1, 1]} : vector<2x128xf32> to vector<2x32xf32>
    %113 = vector.extract_strided_slice %110 {offsets = [0, 64], sizes = [2, 32], strides = [1, 1]} : vector<2x128xf32> to vector<2x32xf32>
    %114 = vector.extract_strided_slice %109 {offsets = [0, 96], sizes = [2, 32], strides = [1, 1]} : vector<2x128xf32> to vector<2x32xf32>
    %115 = arith.mulf %112, %77 : vector<2x32xf32>
    %116 = arith.mulf %111, %113 : vector<2x32xf32>
    %117 = arith.addf %115, %116 : vector<2x32xf32>
    %118 = math.tanh %117 : vector<2x32xf32>
    %119 = arith.mulf %114, %118 : vector<2x32xf32>
    %120 = tpu.concatenate %119, %98 in 1 : vector<2x32xf32>, vector<2x32xf32> -> vector<2x64xf32>
    %cst_34 = arith.constant dense<0.000000e+00> : vector<2x128xf32>
    %121 = tpu.matmul %120, %14, %cst_34 {dimension_numbers = #tpu.dot_dimension_numbers<[1], [0], [0], [1], [0, 0, 1, 1], [], []>} : vector<2x64xf32>, vector<64x128xf32>, vector<2x128xf32> -> vector<2x128xf32>
    %122 = vector.broadcast %15 : vector<1x128xf32> to vector<2x128xf32>
    %123 = arith.addf %121, %122 : vector<2x128xf32>
    %124 = arith.negf %123 : vector<2x128xf32>
    %125 = math.exp %124 : vector<2x128xf32>
    %cst_35 = arith.constant 1.000000e+00 : f32
    %126 = vector.broadcast %cst_35 : f32 to vector<2x128xf32>
    %127 = arith.addf %126, %125 : vector<2x128xf32>
    %128 = arith.divf %126, %127 : vector<2x128xf32>
    %129 = math.tanh %123 : vector<2x128xf32>
    %130 = vector.extract_strided_slice %128 {offsets = [0, 0], sizes = [2, 32], strides = [1, 1]} : vector<2x128xf32> to vector<2x32xf32>
    %131 = vector.extract_strided_slice %128 {offsets = [0, 32], sizes = [2, 32], strides = [1, 1]} : vector<2x128xf32> to vector<2x32xf32>
    %132 = vector.extract_strided_slice %129 {offsets = [0, 64], sizes = [2, 32], strides = [1, 1]} : vector<2x128xf32> to vector<2x32xf32>
    %133 = vector.extract_strided_slice %128 {offsets = [0, 96], sizes = [2, 32], strides = [1, 1]} : vector<2x128xf32> to vector<2x32xf32>
    %134 = arith.mulf %131, %96 : vector<2x32xf32>
    %135 = arith.mulf %130, %132 : vector<2x32xf32>
    %136 = arith.addf %134, %135 : vector<2x32xf32>
    %137 = math.tanh %136 : vector<2x32xf32>
    %138 = arith.mulf %133, %137 : vector<2x32xf32>
    %cst_36 = arith.constant dense<0.000000e+00> : vector<2x16xf32>
    %139 = tpu.matmul %138, %16, %cst_36 {dimension_numbers = #tpu.dot_dimension_numbers<[1], [0], [0], [1], [0, 0, 1, 1], [], []>} : vector<2x32xf32>, vector<32x16xf32>, vector<2x16xf32> -> vector<2x16xf32>
    %140 = vector.broadcast %17 : vector<1x16xf32> to vector<2x16xf32>
    %141 = arith.addf %139, %140 : vector<2x16xf32>
    %142 = vector.extract_strided_slice %12 {offsets = [6, 0], sizes = [2, 128], strides = [1, 1]} : vector<16x128xf32> to vector<2x128xf32>
    %cst_37 = arith.constant dense<0.000000e+00> : vector<2x128xf32>
    %143 = tpu.matmul %119, %13, %cst_37 {dimension_numbers = #tpu.dot_dimension_numbers<[1], [0], [0], [1], [0, 0, 1, 1], [], []>} : vector<2x32xf32>, vector<32x128xf32>, vector<2x128xf32> -> vector<2x128xf32>
    %144 = arith.addf %142, %143 : vector<2x128xf32>
    %145 = arith.negf %144 : vector<2x128xf32>
    %146 = math.exp %145 : vector<2x128xf32>
    %cst_38 = arith.constant 1.000000e+00 : f32
    %147 = vector.broadcast %cst_38 : f32 to vector<2x128xf32>
    %148 = arith.addf %147, %146 : vector<2x128xf32>
    %149 = arith.divf %147, %148 : vector<2x128xf32>
    %150 = math.tanh %144 : vector<2x128xf32>
    %151 = vector.extract_strided_slice %149 {offsets = [0, 0], sizes = [2, 32], strides = [1, 1]} : vector<2x128xf32> to vector<2x32xf32>
    %152 = vector.extract_strided_slice %149 {offsets = [0, 32], sizes = [2, 32], strides = [1, 1]} : vector<2x128xf32> to vector<2x32xf32>
    %153 = vector.extract_strided_slice %150 {offsets = [0, 64], sizes = [2, 32], strides = [1, 1]} : vector<2x128xf32> to vector<2x32xf32>
    %154 = vector.extract_strided_slice %149 {offsets = [0, 96], sizes = [2, 32], strides = [1, 1]} : vector<2x128xf32> to vector<2x32xf32>
    %155 = arith.mulf %152, %117 : vector<2x32xf32>
    %156 = arith.mulf %151, %153 : vector<2x32xf32>
    %157 = arith.addf %155, %156 : vector<2x32xf32>
    %158 = math.tanh %157 : vector<2x32xf32>
    %159 = arith.mulf %154, %158 : vector<2x32xf32>
    %160 = tpu.concatenate %159, %138 in 1 : vector<2x32xf32>, vector<2x32xf32> -> vector<2x64xf32>
    %cst_39 = arith.constant dense<0.000000e+00> : vector<2x128xf32>
    %161 = tpu.matmul %160, %14, %cst_39 {dimension_numbers = #tpu.dot_dimension_numbers<[1], [0], [0], [1], [0, 0, 1, 1], [], []>} : vector<2x64xf32>, vector<64x128xf32>, vector<2x128xf32> -> vector<2x128xf32>
    %162 = vector.broadcast %15 : vector<1x128xf32> to vector<2x128xf32>
    %163 = arith.addf %161, %162 : vector<2x128xf32>
    %164 = arith.negf %163 : vector<2x128xf32>
    %165 = math.exp %164 : vector<2x128xf32>
    %cst_40 = arith.constant 1.000000e+00 : f32
    %166 = vector.broadcast %cst_40 : f32 to vector<2x128xf32>
    %167 = arith.addf %166, %165 : vector<2x128xf32>
    %168 = arith.divf %166, %167 : vector<2x128xf32>
    %169 = math.tanh %163 : vector<2x128xf32>
    %170 = vector.extract_strided_slice %168 {offsets = [0, 0], sizes = [2, 32], strides = [1, 1]} : vector<2x128xf32> to vector<2x32xf32>
    %171 = vector.extract_strided_slice %168 {offsets = [0, 32], sizes = [2, 32], strides = [1, 1]} : vector<2x128xf32> to vector<2x32xf32>
    %172 = vector.extract_strided_slice %169 {offsets = [0, 64], sizes = [2, 32], strides = [1, 1]} : vector<2x128xf32> to vector<2x32xf32>
    %173 = vector.extract_strided_slice %168 {offsets = [0, 96], sizes = [2, 32], strides = [1, 1]} : vector<2x128xf32> to vector<2x32xf32>
    %174 = arith.mulf %171, %136 : vector<2x32xf32>
    %175 = arith.mulf %170, %172 : vector<2x32xf32>
    %176 = arith.addf %174, %175 : vector<2x32xf32>
    %177 = math.tanh %176 : vector<2x32xf32>
    %178 = arith.mulf %173, %177 : vector<2x32xf32>
    %cst_41 = arith.constant dense<0.000000e+00> : vector<2x16xf32>
    %179 = tpu.matmul %178, %16, %cst_41 {dimension_numbers = #tpu.dot_dimension_numbers<[1], [0], [0], [1], [0, 0, 1, 1], [], []>} : vector<2x32xf32>, vector<32x16xf32>, vector<2x16xf32> -> vector<2x16xf32>
    %180 = vector.broadcast %17 : vector<1x16xf32> to vector<2x16xf32>
    %181 = arith.addf %179, %180 : vector<2x16xf32>
    %182 = vector.extract_strided_slice %12 {offsets = [8, 0], sizes = [2, 128], strides = [1, 1]} : vector<16x128xf32> to vector<2x128xf32>
    %cst_42 = arith.constant dense<0.000000e+00> : vector<2x128xf32>
    %183 = tpu.matmul %159, %13, %cst_42 {dimension_numbers = #tpu.dot_dimension_numbers<[1], [0], [0], [1], [0, 0, 1, 1], [], []>} : vector<2x32xf32>, vector<32x128xf32>, vector<2x128xf32> -> vector<2x128xf32>
    %184 = arith.addf %182, %183 : vector<2x128xf32>
    %185 = arith.negf %184 : vector<2x128xf32>
    %186 = math.exp %185 : vector<2x128xf32>
    %cst_43 = arith.constant 1.000000e+00 : f32
    %187 = vector.broadcast %cst_43 : f32 to vector<2x128xf32>
    %188 = arith.addf %187, %186 : vector<2x128xf32>
    %189 = arith.divf %187, %188 : vector<2x128xf32>
    %190 = math.tanh %184 : vector<2x128xf32>
    %191 = vector.extract_strided_slice %189 {offsets = [0, 0], sizes = [2, 32], strides = [1, 1]} : vector<2x128xf32> to vector<2x32xf32>
    %192 = vector.extract_strided_slice %189 {offsets = [0, 32], sizes = [2, 32], strides = [1, 1]} : vector<2x128xf32> to vector<2x32xf32>
    %193 = vector.extract_strided_slice %190 {offsets = [0, 64], sizes = [2, 32], strides = [1, 1]} : vector<2x128xf32> to vector<2x32xf32>
    %194 = vector.extract_strided_slice %189 {offsets = [0, 96], sizes = [2, 32], strides = [1, 1]} : vector<2x128xf32> to vector<2x32xf32>
    %195 = arith.mulf %192, %157 : vector<2x32xf32>
    %196 = arith.mulf %191, %193 : vector<2x32xf32>
    %197 = arith.addf %195, %196 : vector<2x32xf32>
    %198 = math.tanh %197 : vector<2x32xf32>
    %199 = arith.mulf %194, %198 : vector<2x32xf32>
    %200 = tpu.concatenate %199, %178 in 1 : vector<2x32xf32>, vector<2x32xf32> -> vector<2x64xf32>
    %cst_44 = arith.constant dense<0.000000e+00> : vector<2x128xf32>
    %201 = tpu.matmul %200, %14, %cst_44 {dimension_numbers = #tpu.dot_dimension_numbers<[1], [0], [0], [1], [0, 0, 1, 1], [], []>} : vector<2x64xf32>, vector<64x128xf32>, vector<2x128xf32> -> vector<2x128xf32>
    %202 = vector.broadcast %15 : vector<1x128xf32> to vector<2x128xf32>
    %203 = arith.addf %201, %202 : vector<2x128xf32>
    %204 = arith.negf %203 : vector<2x128xf32>
    %205 = math.exp %204 : vector<2x128xf32>
    %cst_45 = arith.constant 1.000000e+00 : f32
    %206 = vector.broadcast %cst_45 : f32 to vector<2x128xf32>
    %207 = arith.addf %206, %205 : vector<2x128xf32>
    %208 = arith.divf %206, %207 : vector<2x128xf32>
    %209 = math.tanh %203 : vector<2x128xf32>
    %210 = vector.extract_strided_slice %208 {offsets = [0, 0], sizes = [2, 32], strides = [1, 1]} : vector<2x128xf32> to vector<2x32xf32>
    %211 = vector.extract_strided_slice %208 {offsets = [0, 32], sizes = [2, 32], strides = [1, 1]} : vector<2x128xf32> to vector<2x32xf32>
    %212 = vector.extract_strided_slice %209 {offsets = [0, 64], sizes = [2, 32], strides = [1, 1]} : vector<2x128xf32> to vector<2x32xf32>
    %213 = vector.extract_strided_slice %208 {offsets = [0, 96], sizes = [2, 32], strides = [1, 1]} : vector<2x128xf32> to vector<2x32xf32>
    %214 = arith.mulf %211, %176 : vector<2x32xf32>
    %215 = arith.mulf %210, %212 : vector<2x32xf32>
    %216 = arith.addf %214, %215 : vector<2x32xf32>
    %217 = math.tanh %216 : vector<2x32xf32>
    %218 = arith.mulf %213, %217 : vector<2x32xf32>
    %cst_46 = arith.constant dense<0.000000e+00> : vector<2x16xf32>
    %219 = tpu.matmul %218, %16, %cst_46 {dimension_numbers = #tpu.dot_dimension_numbers<[1], [0], [0], [1], [0, 0, 1, 1], [], []>} : vector<2x32xf32>, vector<32x16xf32>, vector<2x16xf32> -> vector<2x16xf32>
    %220 = vector.broadcast %17 : vector<1x16xf32> to vector<2x16xf32>
    %221 = arith.addf %219, %220 : vector<2x16xf32>
    %222 = vector.extract_strided_slice %12 {offsets = [10, 0], sizes = [2, 128], strides = [1, 1]} : vector<16x128xf32> to vector<2x128xf32>
    %cst_47 = arith.constant dense<0.000000e+00> : vector<2x128xf32>
    %223 = tpu.matmul %199, %13, %cst_47 {dimension_numbers = #tpu.dot_dimension_numbers<[1], [0], [0], [1], [0, 0, 1, 1], [], []>} : vector<2x32xf32>, vector<32x128xf32>, vector<2x128xf32> -> vector<2x128xf32>
    %224 = arith.addf %222, %223 : vector<2x128xf32>
    %225 = arith.negf %224 : vector<2x128xf32>
    %226 = math.exp %225 : vector<2x128xf32>
    %cst_48 = arith.constant 1.000000e+00 : f32
    %227 = vector.broadcast %cst_48 : f32 to vector<2x128xf32>
    %228 = arith.addf %227, %226 : vector<2x128xf32>
    %229 = arith.divf %227, %228 : vector<2x128xf32>
    %230 = math.tanh %224 : vector<2x128xf32>
    %231 = vector.extract_strided_slice %229 {offsets = [0, 0], sizes = [2, 32], strides = [1, 1]} : vector<2x128xf32> to vector<2x32xf32>
    %232 = vector.extract_strided_slice %229 {offsets = [0, 32], sizes = [2, 32], strides = [1, 1]} : vector<2x128xf32> to vector<2x32xf32>
    %233 = vector.extract_strided_slice %230 {offsets = [0, 64], sizes = [2, 32], strides = [1, 1]} : vector<2x128xf32> to vector<2x32xf32>
    %234 = vector.extract_strided_slice %229 {offsets = [0, 96], sizes = [2, 32], strides = [1, 1]} : vector<2x128xf32> to vector<2x32xf32>
    %235 = arith.mulf %232, %197 : vector<2x32xf32>
    %236 = arith.mulf %231, %233 : vector<2x32xf32>
    %237 = arith.addf %235, %236 : vector<2x32xf32>
    %238 = math.tanh %237 : vector<2x32xf32>
    %239 = arith.mulf %234, %238 : vector<2x32xf32>
    %240 = tpu.concatenate %239, %218 in 1 : vector<2x32xf32>, vector<2x32xf32> -> vector<2x64xf32>
    %cst_49 = arith.constant dense<0.000000e+00> : vector<2x128xf32>
    %241 = tpu.matmul %240, %14, %cst_49 {dimension_numbers = #tpu.dot_dimension_numbers<[1], [0], [0], [1], [0, 0, 1, 1], [], []>} : vector<2x64xf32>, vector<64x128xf32>, vector<2x128xf32> -> vector<2x128xf32>
    %242 = vector.broadcast %15 : vector<1x128xf32> to vector<2x128xf32>
    %243 = arith.addf %241, %242 : vector<2x128xf32>
    %244 = arith.negf %243 : vector<2x128xf32>
    %245 = math.exp %244 : vector<2x128xf32>
    %cst_50 = arith.constant 1.000000e+00 : f32
    %246 = vector.broadcast %cst_50 : f32 to vector<2x128xf32>
    %247 = arith.addf %246, %245 : vector<2x128xf32>
    %248 = arith.divf %246, %247 : vector<2x128xf32>
    %249 = math.tanh %243 : vector<2x128xf32>
    %250 = vector.extract_strided_slice %248 {offsets = [0, 0], sizes = [2, 32], strides = [1, 1]} : vector<2x128xf32> to vector<2x32xf32>
    %251 = vector.extract_strided_slice %248 {offsets = [0, 32], sizes = [2, 32], strides = [1, 1]} : vector<2x128xf32> to vector<2x32xf32>
    %252 = vector.extract_strided_slice %249 {offsets = [0, 64], sizes = [2, 32], strides = [1, 1]} : vector<2x128xf32> to vector<2x32xf32>
    %253 = vector.extract_strided_slice %248 {offsets = [0, 96], sizes = [2, 32], strides = [1, 1]} : vector<2x128xf32> to vector<2x32xf32>
    %254 = arith.mulf %251, %216 : vector<2x32xf32>
    %255 = arith.mulf %250, %252 : vector<2x32xf32>
    %256 = arith.addf %254, %255 : vector<2x32xf32>
    %257 = math.tanh %256 : vector<2x32xf32>
    %258 = arith.mulf %253, %257 : vector<2x32xf32>
    %cst_51 = arith.constant dense<0.000000e+00> : vector<2x16xf32>
    %259 = tpu.matmul %258, %16, %cst_51 {dimension_numbers = #tpu.dot_dimension_numbers<[1], [0], [0], [1], [0, 0, 1, 1], [], []>} : vector<2x32xf32>, vector<32x16xf32>, vector<2x16xf32> -> vector<2x16xf32>
    %260 = vector.broadcast %17 : vector<1x16xf32> to vector<2x16xf32>
    %261 = arith.addf %259, %260 : vector<2x16xf32>
    %262 = vector.extract_strided_slice %12 {offsets = [12, 0], sizes = [2, 128], strides = [1, 1]} : vector<16x128xf32> to vector<2x128xf32>
    %cst_52 = arith.constant dense<0.000000e+00> : vector<2x128xf32>
    %263 = tpu.matmul %239, %13, %cst_52 {dimension_numbers = #tpu.dot_dimension_numbers<[1], [0], [0], [1], [0, 0, 1, 1], [], []>} : vector<2x32xf32>, vector<32x128xf32>, vector<2x128xf32> -> vector<2x128xf32>
    %264 = arith.addf %262, %263 : vector<2x128xf32>
    %265 = arith.negf %264 : vector<2x128xf32>
    %266 = math.exp %265 : vector<2x128xf32>
    %cst_53 = arith.constant 1.000000e+00 : f32
    %267 = vector.broadcast %cst_53 : f32 to vector<2x128xf32>
    %268 = arith.addf %267, %266 : vector<2x128xf32>
    %269 = arith.divf %267, %268 : vector<2x128xf32>
    %270 = math.tanh %264 : vector<2x128xf32>
    %271 = vector.extract_strided_slice %269 {offsets = [0, 0], sizes = [2, 32], strides = [1, 1]} : vector<2x128xf32> to vector<2x32xf32>
    %272 = vector.extract_strided_slice %269 {offsets = [0, 32], sizes = [2, 32], strides = [1, 1]} : vector<2x128xf32> to vector<2x32xf32>
    %273 = vector.extract_strided_slice %270 {offsets = [0, 64], sizes = [2, 32], strides = [1, 1]} : vector<2x128xf32> to vector<2x32xf32>
    %274 = vector.extract_strided_slice %269 {offsets = [0, 96], sizes = [2, 32], strides = [1, 1]} : vector<2x128xf32> to vector<2x32xf32>
    %275 = arith.mulf %272, %237 : vector<2x32xf32>
    %276 = arith.mulf %271, %273 : vector<2x32xf32>
    %277 = arith.addf %275, %276 : vector<2x32xf32>
    %278 = math.tanh %277 : vector<2x32xf32>
    %279 = arith.mulf %274, %278 : vector<2x32xf32>
    %280 = tpu.concatenate %279, %258 in 1 : vector<2x32xf32>, vector<2x32xf32> -> vector<2x64xf32>
    %cst_54 = arith.constant dense<0.000000e+00> : vector<2x128xf32>
    %281 = tpu.matmul %280, %14, %cst_54 {dimension_numbers = #tpu.dot_dimension_numbers<[1], [0], [0], [1], [0, 0, 1, 1], [], []>} : vector<2x64xf32>, vector<64x128xf32>, vector<2x128xf32> -> vector<2x128xf32>
    %282 = vector.broadcast %15 : vector<1x128xf32> to vector<2x128xf32>
    %283 = arith.addf %281, %282 : vector<2x128xf32>
    %284 = arith.negf %283 : vector<2x128xf32>
    %285 = math.exp %284 : vector<2x128xf32>
    %cst_55 = arith.constant 1.000000e+00 : f32
    %286 = vector.broadcast %cst_55 : f32 to vector<2x128xf32>
    %287 = arith.addf %286, %285 : vector<2x128xf32>
    %288 = arith.divf %286, %287 : vector<2x128xf32>
    %289 = math.tanh %283 : vector<2x128xf32>
    %290 = vector.extract_strided_slice %288 {offsets = [0, 0], sizes = [2, 32], strides = [1, 1]} : vector<2x128xf32> to vector<2x32xf32>
    %291 = vector.extract_strided_slice %288 {offsets = [0, 32], sizes = [2, 32], strides = [1, 1]} : vector<2x128xf32> to vector<2x32xf32>
    %292 = vector.extract_strided_slice %289 {offsets = [0, 64], sizes = [2, 32], strides = [1, 1]} : vector<2x128xf32> to vector<2x32xf32>
    %293 = vector.extract_strided_slice %288 {offsets = [0, 96], sizes = [2, 32], strides = [1, 1]} : vector<2x128xf32> to vector<2x32xf32>
    %294 = arith.mulf %291, %256 : vector<2x32xf32>
    %295 = arith.mulf %290, %292 : vector<2x32xf32>
    %296 = arith.addf %294, %295 : vector<2x32xf32>
    %297 = math.tanh %296 : vector<2x32xf32>
    %298 = arith.mulf %293, %297 : vector<2x32xf32>
    %cst_56 = arith.constant dense<0.000000e+00> : vector<2x16xf32>
    %299 = tpu.matmul %298, %16, %cst_56 {dimension_numbers = #tpu.dot_dimension_numbers<[1], [0], [0], [1], [0, 0, 1, 1], [], []>} : vector<2x32xf32>, vector<32x16xf32>, vector<2x16xf32> -> vector<2x16xf32>
    %300 = vector.broadcast %17 : vector<1x16xf32> to vector<2x16xf32>
    %301 = arith.addf %299, %300 : vector<2x16xf32>
    %302 = vector.extract_strided_slice %12 {offsets = [14, 0], sizes = [2, 128], strides = [1, 1]} : vector<16x128xf32> to vector<2x128xf32>
    %cst_57 = arith.constant dense<0.000000e+00> : vector<2x128xf32>
    %303 = tpu.matmul %279, %13, %cst_57 {dimension_numbers = #tpu.dot_dimension_numbers<[1], [0], [0], [1], [0, 0, 1, 1], [], []>} : vector<2x32xf32>, vector<32x128xf32>, vector<2x128xf32> -> vector<2x128xf32>
    %304 = arith.addf %302, %303 : vector<2x128xf32>
    %305 = arith.negf %304 : vector<2x128xf32>
    %306 = math.exp %305 : vector<2x128xf32>
    %cst_58 = arith.constant 1.000000e+00 : f32
    %307 = vector.broadcast %cst_58 : f32 to vector<2x128xf32>
    %308 = arith.addf %307, %306 : vector<2x128xf32>
    %309 = arith.divf %307, %308 : vector<2x128xf32>
    %310 = math.tanh %304 : vector<2x128xf32>
    %311 = vector.extract_strided_slice %309 {offsets = [0, 0], sizes = [2, 32], strides = [1, 1]} : vector<2x128xf32> to vector<2x32xf32>
    %312 = vector.extract_strided_slice %309 {offsets = [0, 32], sizes = [2, 32], strides = [1, 1]} : vector<2x128xf32> to vector<2x32xf32>
    %313 = vector.extract_strided_slice %310 {offsets = [0, 64], sizes = [2, 32], strides = [1, 1]} : vector<2x128xf32> to vector<2x32xf32>
    %314 = vector.extract_strided_slice %309 {offsets = [0, 96], sizes = [2, 32], strides = [1, 1]} : vector<2x128xf32> to vector<2x32xf32>
    %315 = arith.mulf %312, %277 : vector<2x32xf32>
    %316 = arith.mulf %311, %313 : vector<2x32xf32>
    %317 = arith.addf %315, %316 : vector<2x32xf32>
    %318 = math.tanh %317 : vector<2x32xf32>
    %319 = arith.mulf %314, %318 : vector<2x32xf32>
    %320 = tpu.concatenate %319, %298 in 1 : vector<2x32xf32>, vector<2x32xf32> -> vector<2x64xf32>
    %cst_59 = arith.constant dense<0.000000e+00> : vector<2x128xf32>
    %321 = tpu.matmul %320, %14, %cst_59 {dimension_numbers = #tpu.dot_dimension_numbers<[1], [0], [0], [1], [0, 0, 1, 1], [], []>} : vector<2x64xf32>, vector<64x128xf32>, vector<2x128xf32> -> vector<2x128xf32>
    %322 = vector.broadcast %15 : vector<1x128xf32> to vector<2x128xf32>
    %323 = arith.addf %321, %322 : vector<2x128xf32>
    %324 = arith.negf %323 : vector<2x128xf32>
    %325 = math.exp %324 : vector<2x128xf32>
    %cst_60 = arith.constant 1.000000e+00 : f32
    %326 = vector.broadcast %cst_60 : f32 to vector<2x128xf32>
    %327 = arith.addf %326, %325 : vector<2x128xf32>
    %328 = arith.divf %326, %327 : vector<2x128xf32>
    %329 = math.tanh %323 : vector<2x128xf32>
    %330 = vector.extract_strided_slice %328 {offsets = [0, 0], sizes = [2, 32], strides = [1, 1]} : vector<2x128xf32> to vector<2x32xf32>
    %331 = vector.extract_strided_slice %328 {offsets = [0, 32], sizes = [2, 32], strides = [1, 1]} : vector<2x128xf32> to vector<2x32xf32>
    %332 = vector.extract_strided_slice %329 {offsets = [0, 64], sizes = [2, 32], strides = [1, 1]} : vector<2x128xf32> to vector<2x32xf32>
    %333 = vector.extract_strided_slice %328 {offsets = [0, 96], sizes = [2, 32], strides = [1, 1]} : vector<2x128xf32> to vector<2x32xf32>
    %334 = arith.mulf %331, %296 : vector<2x32xf32>
    %335 = arith.mulf %330, %332 : vector<2x32xf32>
    %336 = arith.addf %334, %335 : vector<2x32xf32>
    %337 = math.tanh %336 : vector<2x32xf32>
    %338 = arith.mulf %333, %337 : vector<2x32xf32>
    %cst_61 = arith.constant dense<0.000000e+00> : vector<2x16xf32>
    %339 = tpu.matmul %338, %16, %cst_61 {dimension_numbers = #tpu.dot_dimension_numbers<[1], [0], [0], [1], [0, 0, 1, 1], [], []>} : vector<2x32xf32>, vector<32x16xf32>, vector<2x16xf32> -> vector<2x16xf32>
    %340 = vector.broadcast %17 : vector<1x16xf32> to vector<2x16xf32>
    %341 = arith.addf %339, %340 : vector<2x16xf32>
    %342 = arith.maximumf %61, %101 : vector<2x16xf32>
    %343 = arith.maximumf %342, %141 : vector<2x16xf32>
    %344 = arith.maximumf %343, %181 : vector<2x16xf32>
    %345 = arith.maximumf %344, %221 : vector<2x16xf32>
    %346 = arith.maximumf %345, %261 : vector<2x16xf32>
    %347 = arith.maximumf %346, %301 : vector<2x16xf32>
    %348 = arith.maximumf %347, %341 : vector<2x16xf32>
    %cst_62 = arith.constant 0.000000e+00 : f32
    %349 = vector.broadcast %cst_62 : f32 to vector<2x16xf32>
    %350 = arith.subf %61, %348 : vector<2x16xf32>
    %351 = math.exp %350 : vector<2x16xf32>
    %352 = arith.addf %349, %351 : vector<2x16xf32>
    %353 = arith.subf %101, %348 : vector<2x16xf32>
    %354 = math.exp %353 : vector<2x16xf32>
    %355 = arith.addf %352, %354 : vector<2x16xf32>
    %356 = arith.subf %141, %348 : vector<2x16xf32>
    %357 = math.exp %356 : vector<2x16xf32>
    %358 = arith.addf %355, %357 : vector<2x16xf32>
    %359 = arith.subf %181, %348 : vector<2x16xf32>
    %360 = math.exp %359 : vector<2x16xf32>
    %361 = arith.addf %358, %360 : vector<2x16xf32>
    %362 = arith.subf %221, %348 : vector<2x16xf32>
    %363 = math.exp %362 : vector<2x16xf32>
    %364 = arith.addf %361, %363 : vector<2x16xf32>
    %365 = arith.subf %261, %348 : vector<2x16xf32>
    %366 = math.exp %365 : vector<2x16xf32>
    %367 = arith.addf %364, %366 : vector<2x16xf32>
    %368 = arith.subf %301, %348 : vector<2x16xf32>
    %369 = math.exp %368 : vector<2x16xf32>
    %370 = arith.addf %367, %369 : vector<2x16xf32>
    %371 = arith.subf %341, %348 : vector<2x16xf32>
    %372 = math.exp %371 : vector<2x16xf32>
    %373 = arith.addf %370, %372 : vector<2x16xf32>
    %374 = math.log %373 : vector<2x16xf32>
    %375 = arith.addf %348, %374 : vector<2x16xf32>
    %376 = arith.subf %61, %375 : vector<2x16xf32>
    %377 = arith.subf %101, %375 : vector<2x16xf32>
    %378 = arith.subf %141, %375 : vector<2x16xf32>
    %379 = arith.subf %181, %375 : vector<2x16xf32>
    %380 = arith.subf %221, %375 : vector<2x16xf32>
    %381 = arith.subf %261, %375 : vector<2x16xf32>
    %382 = arith.subf %301, %375 : vector<2x16xf32>
    %383 = arith.subf %341, %375 : vector<2x16xf32>
    %384 = tpu.concatenate %376, %377, %378, %379, %380, %381, %382, %383 in 1 : vector<2x16xf32>, vector<2x16xf32>, vector<2x16xf32>, vector<2x16xf32>, vector<2x16xf32>, vector<2x16xf32>, vector<2x16xf32>, vector<2x16xf32> -> vector<2x128xf32>
    %c0_63 = arith.constant 0 : index
    %c0_64 = arith.constant 0 : index
    %385 = vector.load %arg9[%c0_63, %c0_64] : memref<2x128xf32, #tpu.memory_space<vmem>>, vector<2x128xf32>
    tpu.vector_store %arg9[%c0_63, %c0_64], %384 {strides = array<i32>} : memref<2x128xf32, #tpu.memory_space<vmem>>, vector<2x128xf32>,
    return
  }
}

</mosaic_0001>

<bundles_post_ra>
// kernel: rnn_pos_tagger_forward.1
= control target key start
LH: loop header
LB: loop body
LE: loop exit
PB: predicated region body
PF: predicated region fallthrough
CT: control target
= control target key end

     0   :  { %v3384_v0 = vmov 0   ;;  %v3385_v14 = vmov 0.0   ;;  %v34_v15 = vlaneseq  ;;  %vm56_vm0 = vcmask 523264   ;;  %s3387_s23 = smov 64   ;;  %s3392_s13 = smov 80   ;;  %s4238_s0 = inlined_call_operand.vmem [shape: s32[16,1], index: 0, kind: input, shape index: {}]   ;;  %s4239_s1 = inlined_call_operand.vmem [shape: f32[64,32], index: 1, kind: input, shape index: {}]   ;;  %s4240_s2 = inlined_call_operand.vmem [shape: f32[32,128], index: 2, kind: input, shape index: {}]   ;;  %s4241_s3 = inlined_call_operand.vmem [shape: f32[32,128], index: 3, kind: input, shape index: {}]   ;;  %s4242_s4 = inlined_call_operand.vmem [shape: f32[1,128], index: 4, kind: input, shape index: {}]   ;;  %s4243_s5 = inlined_call_operand.vmem [shape: f32[64,128], index: 5, kind: input, shape index: {}]   ;;  %s4244_s6 = inlined_call_operand.vmem [shape: f32[1,128], index: 6, kind: input, shape index: {}]   ;;  %s4245_s7 = inlined_call_operand.vmem [shape: f32[32,16], index: 7, kind: input, shape index: {}]   ;;  %s4246_s8 = inlined_call_operand.vmem [shape: f32[1,16], index: 8, kind: input, shape index: {}]   ;;  %s4247_s9 = inlined_call_operand.vmem [shape: f32[2,128], index: 9, kind: output, shape index: {}]  }
   0x1   :  { %3220 = vset.pattern.permute.xlu0 %v3384_v0  ;;  %v32_v1 = vld [vmem:[%s4238_s0] sm:$0xff]  ;;  %v55_v2 = vld [vmem:[%s4239_s1 + $0x38] sm:$0xff]  ;;  %v54_v3 = vld [vmem:[%s4239_s1 + $0x30] sm:$0xff]  ;;  %vm3386_vm3 = vmmov 0   ;;  %vm149_vm4 = vcmask 261120   ;;  %s3393_s14 = smov 112  }
   0x2   :  { %37 = vperm.xlu0 %3220, %v32_v1   ;;  %2852 = vmatprep.subr.mxu0 %v55_v2  ;;  %v33_v4 = vld [vmem:[%s4238_s0 + $0x8] sm:$0xff]  ;;  %v52_v6 = vld [vmem:[%s4239_s1 + $0x20] sm:$0xff]  ;;  %v141_v7 = vld [vmem:[%s4240_s2 + $0x18] sm:$0xff]  ;;  %v35_v16 = vand.u32 127, %v34_v15  ;;  %vm2619_vm5 = vcmask 130048   ;;  %vm2622_vm6 = vcmask 392192  }
   0x3   :  { %2853 = vmatpush3.msra.mxu0 %v55_v2  ;;  %v53_v5 = vld [vmem:[%s4239_s1 + $0x28] sm:$0xff]  ;;  %v140_v8 = vld [vmem:[%s4240_s2 + $0x10] sm:$0xff]  ;;  %v51_v9 = vld [vmem:[%s4239_s1 + $0x18] sm:$0xff]  ;;  %2871 = vmatprep.subr.mxu1 %v141_v7  ;;  %vm2625_vm7 = vcmask 654336   ;;  %vm2627_vm8 = vcmask 785408   ;;  %vm2629_vm9 = vcmask 916480  }
   0x4   :  { %2854 = vmatprep.subr.mxu0 %v54_v3  ;;  %2872 = vmatpush3.msra.mxu1 %v141_v7  ;;  %v139_v10 = vld [vmem:[%s4240_s2 + $0x8] sm:$0xff]  ;;  %v50_v11 = vld [vmem:[%s4239_s1 + $0x10] sm:$0xff]  ;;  %v48_v13 = vld [vmem:[%s4239_s1] sm:$0xff] }
   0x5   :  { %2855 = vmatpush3.msra.mxu0 %v54_v3  ;;  %2873 = vmatprep.subr.mxu1 %v140_v8  ;;  %v49_v12 = vld [vmem:[%s4239_s1 + $0x8] sm:$0xff]  ;;  %v138_v21 = vld [vmem:[%s4240_s2] sm:$0xff]  ;;  %v3497_v24 = vld [vmem:[%s4241_s3 + $0x18] sm:$0xff]  ;;  %s3390_s1 = smov 48  }
   0x6   :  { %40 = vperm.xlu0 %3220, %v33_v4   ;;  %2856 = vmatprep.subr.mxu0 %v53_v5  ;;  %v3504_v25 = vld [vmem:[%s4241_s3 + $0x10] sm:$0xff]  ;;  %v3513_v26 = vld [vmem:[%s4241_s3 + $0x8] sm:$0xff]  ;;  %v3520_v27 = vld [vmem:[%s4241_s3] sm:$0xff] }
   0x7   :  { %2857 = vmatpush3.msra.mxu0 %v53_v5  ;;  %2874 = vmatpush3.msra.mxu1 %v140_v8  ;;  %v2640_v28 = vld [vmem:[%s4242_s4] ss:$0 sm:$0xff]  ;;  %s3388_s4 = smov 32   ;;  %v3545_v46 = vld [vmem:[%s4243_s5 + $0x38] sm:$0xff]  ;;  %v3550_v47 = vld [vmem:[%s4243_s5 + $0x30] sm:$0xff] }
   0x8   :  { %2858 = vmatprep.subr.mxu0 %v52_v6  ;;  %2875 = vmatprep.subr.mxu1 %v139_v10  ;;  %v3557_v48 = vld [vmem:[%s4243_s5 + $0x28] sm:$0xff]  ;;  %v3564_v49 = vld [vmem:[%s4243_s5 + $0x20] sm:$0xff]  ;;  %v3571_v50 = vld [vmem:[%s4243_s5 + $0x18] sm:$0xff] }
   0x9   :  { %2859 = vmatpush3.msra.mxu0 %v52_v6  ;;  %2876 = vmatpush3.msra.mxu1 %v139_v10  ;;  %v3578_v51 = vld [vmem:[%s4243_s5 + $0x10] sm:$0xff]  ;;  %v3586_v53 = vld [vmem:[%s4243_s5 + $0x8] sm:$0xff]  ;;  %v3595_v54 = vld [vmem:[%s4243_s5] sm:$0xff] }
   0xa   :  { %2860 = vmatprep.subr.mxu0 %v51_v9  ;;  %2877 = vmatprep.subr.mxu1 %v138_v21  ;;  %v3626_v59 = vld [vmem:[%s4244_s6] ss:$0 sm:$0xff]  ;;  %v3642_v10 = vld [vmem:[%s4245_s7 + $0x10] sm:$0xff] }
   0xb   :  { %2861 = vmatpush3.msra.mxu0 %v51_v9  ;;  %2878 = vmatpush3.msra.mxu1 %v138_v21  ;;  %v3637_v9 = vld [vmem:[%s4245_s7 + $0x18] sm:$0xff] }
   0xc   :  { %2862 = vmatprep.subr.mxu0 %v50_v11  ;;  %2882 = vmatprep.subr.mxu1 %v3385_v14 }
   0xd   :  { %2863 = vmatpush3.msra.mxu0 %v50_v11  ;;  %v3649_v11 = vld [vmem:[%s4245_s7 + $0x8] sm:$0xff] }
   0xe   :  { %2864 = vmatprep.subr.mxu0 %v49_v12 }
   0xf   :  { %2865 = vmatpush3.msra.mxu0 %v49_v12  ;;  %v3656_v12 = vld [vmem:[%s4245_s7] sm:$0xff] }
  0x10   :  { %2866 = vmatprep.subr.mxu0 %v48_v13 }
  0x11   :  { %2867 = vmatpush3.msra.mxu0 %v48_v13 }
  0x12   :  { %2893 = vmatprep.subr.mxu0 %v3385_v14 }
  0x7d   :  { %v38_v17 = vpop.permute.xlu0 %37 }
  0x7e   :  { %vm42_vm1 = vcmp.eq.s32.totalorder %v38_v17, %v35_v16 }
  0x7f   :  { %v2636_v18 = vsel %vm42_vm1, 1.0, %v3385_v14 }
  0x80   :  { %2868 = vmatprep.mubr.msk.f32.mxu0 %vm56_vm0, %v2636_v18 }
  0x81   :  { %v41_v19 = vpop.permute.xlu0 %40 }
  0x82   :  { %vm43_vm2 = vcmp.eq.s32.totalorder %v41_v19, %v35_v16 }
  0x83   :  { %v2637_v20 = vsel %vm43_vm2, 1.0, %v3385_v14 }
  0x84   :  { %2869 = vmatmul.mubr.msk.f32.vlgmr.msra.gmra.mxu0 %vm56_vm0, %v2637_v20 }
  0x85   :  { %2909 = vmatprep.mubr.msk.f32.mxu0 %vm3386_vm3, %v3385_v14  ;;  %2894 = vmatpush3.msra.mxu0 %v3545_v46 }
  0x86   :  { %2895 = vmatprep.subr.mxu0 %v3385_v14 }
  0x87   :  { %2896 = vmatpush3.msra.mxu0 %v3550_v47 }
  0x88   :  { %2897 = vmatprep.subr.mxu0 %v3385_v14 }
  0x89   :  { %2898 = vmatpush3.msra.mxu0 %v3557_v48 }
  0x8a   :  { %2899 = vmatprep.subr.mxu0 %v3385_v14 }
  0x8b   :  { %2900 = vmatpush3.msra.mxu0 %v3564_v49 }
  0x8c   :  { %2901 = vmatprep.subr.mxu0 %v3385_v14 }
  0x8d   :  { %2902 = vmatpush3.msra.mxu0 %v3571_v50 }
  0x8e   :  { %2903 = vmatprep.subr.mxu0 %v3385_v14 }
  0x8f   :  { %2904 = vmatpush3.msra.mxu0 %v3578_v51 }
  0x90   :  { %2905 = vmatprep.subr.mxu0 %v3385_v14 }
  0x91   :  { %2906 = vmatpush3.msra.mxu0 %v3586_v53 }
  0x92   :  { %2907 = vmatprep.subr.mxu0 %v3385_v14 }
  0x93   :  { %2908 = vmatpush3.msra.mxu0 %v3595_v54 }
  0x94   :  { %2934 = vmatprep.subr.mxu0 %v3385_v14 }
 0x144   :  { %v2870_v22 = vpop.f32.mrf.mxu0 }
 0x146   :  { %v129_v23 = vpop.f32.mrf.mxu0 }
 0x147   :  { %2879 = vmatprep.mubr.msk.f32.mxu1 %vm149_vm4, %v129_v23 }
 0x148   :  { %2880 = vmatmul.mubr.msk.f32.vlgmr.msra.gmra.mxu1 %vm149_vm4, %v2870_v22 }
 0x149   :  { %2883 = vmatpush3.msra.mxu1 %v3497_v24  ;;  %2890 = vmatprep.mubr.msk.f32.mxu1 %vm3386_vm3, %v3385_v14 }
 0x14a   :  { %2884 = vmatprep.subr.mxu1 %v3385_v14 }
 0x14b   :  { %2885 = vmatpush3.msra.mxu1 %v3504_v25 }
 0x14c   :  { %2886 = vmatprep.subr.mxu1 %v3385_v14 }
 0x14d   :  { %2887 = vmatpush3.msra.mxu1 %v3513_v26 }
 0x14e   :  { %2888 = vmatprep.subr.mxu1 %v3385_v14 }
 0x14f   :  { %2889 = vmatpush3.msra.mxu1 %v3520_v27 }
 0x150   :  { %2891 = vmatmul.mubr.f32.vlgmr.msra.gmra.mxu1 %v3385_v14  ;;  %2912 = vmatprep.subr.mxu1 %v3385_v14 }
 0x151   :  { %2920 = vmatprep.mubr.msk.f32.mxu1 %vm3386_vm3, %v3385_v14  ;;  %2913 = vmatpush3.msra.mxu1 %v3637_v9 }
 0x152   :  { %2914 = vmatprep.subr.mxu1 %v3385_v14 }
 0x153   :  { %2915 = vmatpush3.msra.mxu1 %v3642_v10 }
 0x154   :  { %2916 = vmatprep.subr.mxu1 %v3385_v14 }
 0x155   :  { %2917 = vmatpush3.msra.mxu1 %v3649_v11 }
 0x156   :  { %2918 = vmatprep.subr.mxu1 %v3385_v14 }
 0x157   :  { %2919 = vmatpush3.msra.mxu1 %v3656_v12 }
 0x158   :  { %2923 = vmatprep.subr.mxu1 %v3385_v14 }
 0x208   :  { %v2881_v29 = vpop.f32.mrf.mxu1 }
 0x209   :  { %v3532_v30 = vadd.f32 %v2881_v29, %v2640_v28 }
 0x20a   :  { %v222_v31 = vpop.f32.mrf.mxu1 }
 0x20b   :  { %v3534_v32 = vadd.f32 %v2640_v28, %v222_v31 }
 0x210   :  { %v318_v33 = vpop.f32.mrf.mxu1 }
 0x211   :  { %v322_v34 = vadd.f32 %v318_v33, %v3534_v32 }
 0x212   :  { %v2892_v35 = vpop.f32.mrf.mxu1 }
 0x213   :  { %3221 = vtanh.f32 %v322_v34  ;;  %v2643_v37 = vmul.f32 -1.442695, %v322_v34 }
 0x215   :  { %3223 = vpow2.f32 %v2643_v37 }
 0x220   :  { %v3222_v36 = vpop.eup %3221 }
 0x221   :  { %332 = vrot.lane.b32.xlu1 %v3222_v36, %s3387_s23 }
 0x222   :  { %v3224_v38 = vpop.eup %3223 }
 0x223   :  { %v326_v39 = vadd.f32 1.0, %v3224_v38 }
 0x225   :  { %3225 = vrcp.f32 %v326_v39 }
 0x232   :  { %v3226_v40 = vpop.eup %3225 }
 0x233   :  { %v330_v43 = vmul.f32 0.0, %v3226_v40 }
 0x293   :  { %v333_v41 = vpop.permute.xlu1 %332 }
 0x294   :  { %v335_v42 = vmul.f32 %v3226_v40, %v333_v41 }
 0x296   :  { %337 = vrot.lane.b32.xlu1 %v335_v42, %s3388_s4 }
 0x308   :  { %v338_v44 = vpop.permute.xlu1 %337 }
 0x309   :  { %v3539_v45 = vadd.f32 %v338_v44, %v330_v43 }
 0x30b   :  { %3227 = vtanh.f32 %v3539_v45  ;;  %v620_v37 = vrot.slane %v3539_v45, 6 }
 0x318   :  { %v3228_v52 = vpop.eup %3227 }
 0x319   :  { %343 = vrot.lane.b32.xlu0 %v3228_v52, %s3387_s23 }
 0x38b   :  { %v344_v55 = vpop.permute.xlu0 %343 }
 0x38c   :  { %v346_v56 = vmul.f32 %v3226_v40, %v344_v55 }
 0x38e   :  { %348 = vrot.lane.b32.xlu1 %v346_v56, %s3388_s4 }
 0x400   :  { %v3600_v57 = vpop.permute.xlu1 %348 }
 0x401   :  { %v351_v58 = vsel %vm149_vm4, %v3600_v57, 0.0 }
 0x402   :  { %2910 = vmatmul.mubr.msk.f32.vlgmr.msra.gmra.mxu0 %vm56_vm0, %v351_v58 }
 0x403   :  { %2935 = vmatpush3.msra.mxu0 %v3545_v46  ;;  %2950 = vmatprep.mubr.msk.f32.mxu0 %vm3386_vm3, %v3385_v14 }
 0x404   :  { %2936 = vmatprep.subr.mxu0 %v3385_v14 }
 0x405   :  { %2937 = vmatpush3.msra.mxu0 %v3550_v47 }
 0x406   :  { %2938 = vmatprep.subr.mxu0 %v3385_v14 }
 0x407   :  { %2939 = vmatpush3.msra.mxu0 %v3557_v48 }
 0x408   :  { %2940 = vmatprep.subr.mxu0 %v3385_v14 }
 0x409   :  { %2941 = vmatpush3.msra.mxu0 %v3564_v49 }
 0x40a   :  { %2942 = vmatprep.subr.mxu0 %v3385_v14 }
 0x40b   :  { %2943 = vmatpush3.msra.mxu0 %v3571_v50 }
 0x40c   :  { %2944 = vmatprep.subr.mxu0 %v3385_v14 }
 0x40d   :  { %2945 = vmatpush3.msra.mxu0 %v3578_v51 }
 0x40e   :  { %2946 = vmatprep.subr.mxu0 %v3385_v14 }
 0x40f   :  { %2947 = vmatpush3.msra.mxu0 %v3586_v53 }
 0x410   :  { %2948 = vmatprep.subr.mxu0 %v3385_v14 }
 0x411   :  { %2949 = vmatpush3.msra.mxu0 %v3595_v54 }
 0x412   :  { %2975 = vmatprep.subr.mxu0 %v3385_v14 }
 0x4c2   :  { %v427_v60 = vpop.f32.mrf.mxu0 }
 0x4c3   :  { %v428_v61 = vadd.f32 %v3626_v59, %v427_v60 }
 0x4c4   :  { %v2911_v62 = vpop.f32.mrf.mxu0 }
 0x4c5   :  { %3229 = vtanh.f32 %v428_v61  ;;  %v2646_v0 = vmul.f32 -1.442695, %v428_v61 }
 0x4c7   :  { %3231 = vpow2.f32 %v2646_v0 }
 0x4d2   :  { %v3230_v63 = vpop.eup %3229 }
 0x4d3   :  { %440 = vrot.lane.b32.xlu0 %v3230_v63, %s3387_s23 }
 0x4d4   :  { %v3232_v1 = vpop.eup %3231 }
 0x4d5   :  { %v434_v2 = vadd.f32 1.0, %v3232_v1 }
 0x4d7   :  { %3233 = vrcp.f32 %v434_v2 }
 0x4e4   :  { %v3234_v3 = vpop.eup %3233 }
 0x4e5   :  { %v438_v6 = vmul.f32 0.0, %v3234_v3 }
 0x545   :  { %v441_v4 = vpop.permute.xlu0 %440 }
 0x546   :  { %v443_v5 = vmul.f32 %v3234_v3, %v441_v4 }
 0x548   :  { %445 = vrot.lane.b32.xlu1 %v443_v5, %s3388_s4 }
 0x5ba   :  { %v446_v7 = vpop.permute.xlu1 %445 }
 0x5bb   :  { %v3631_v8 = vadd.f32 %v446_v7, %v438_v6 }
 0x5bd   :  { %3235 = vtanh.f32 %v3631_v8 }
 0x5ca   :  { %v3236_v13 = vpop.eup %3235 }
 0x5cb   :  { %451 = vrot.lane.b32.xlu0 %v3236_v13, %s3387_s23 }
 0x63d   :  { %v452_v15 = vpop.permute.xlu0 %451 }
 0x63e   :  { %v454_v16 = vmul.f32 %v3234_v3, %v452_v15 }
 0x640   :  { %462 = vrot.lane.b32.xlu1 %v454_v16, %s3388_s4  ;;  %v643_v42 = vrot.slane %v454_v16, 6 }
 0x6b2   :  { %v463_v17 = vpop.permute.xlu1 %462 }
 0x6b3   :  { %2921 = vmatmul.mubr.msk.f32.vlgmr.msra.gmra.mxu1 %vm149_vm4, %v463_v17 }
 0x6b4   :  { %2924 = vmatpush3.msra.mxu1 %v3497_v24  ;;  %2931 = vmatprep.mubr.msk.f32.mxu1 %vm3386_vm3, %v3385_v14 }
 0x6b5   :  { %2925 = vmatprep.subr.mxu1 %v3385_v14 }
 0x6b6   :  { %2926 = vmatpush3.msra.mxu1 %v3504_v25 }
 0x6b7   :  { %2927 = vmatprep.subr.mxu1 %v3385_v14 }
 0x6b8   :  { %2928 = vmatpush3.msra.mxu1 %v3513_v26 }
 0x6b9   :  { %2929 = vmatprep.subr.mxu1 %v3385_v14 }
 0x6ba   :  { %2930 = vmatpush3.msra.mxu1 %v3520_v27 }
 0x6bb   :  { %2932 = vmatmul.mubr.msk.f32.vlgmr.msra.gmra.mxu1 %vm149_vm4, %v3600_v57  ;;  %2953 = vmatprep.subr.mxu1 %v3385_v14 }
 0x6bc   :  { %2954 = vmatpush3.msra.mxu1 %v3637_v9  ;;  %2961 = vmatprep.mubr.msk.f32.mxu1 %vm3386_vm3, %v3385_v14 }
 0x6bd   :  { %2955 = vmatprep.subr.mxu1 %v3385_v14 }
 0x6be   :  { %2956 = vmatpush3.msra.mxu1 %v3642_v10 }
 0x6bf   :  { %2957 = vmatprep.subr.mxu1 %v3385_v14 }
 0x6c0   :  { %2958 = vmatpush3.msra.mxu1 %v3649_v11 }
 0x6c1   :  { %2959 = vmatprep.subr.mxu1 %v3385_v14 }
 0x6c2   :  { %2960 = vmatpush3.msra.mxu1 %v3656_v12 }
 0x6c3   :  { %2964 = vmatprep.subr.mxu1 %v3385_v14 }
 0x773   :  { %v3687_v18 = vpop.f32.mrf.mxu1 }
 0x775   :  { %v2922_v19 = vpop.f32.mrf.mxu1 }
 0x77b   :  { %v604_v20 = vpop.f32.mrf.mxu1 }
 0x77c   :  { %v609_v21 = vrot.slane %v604_v20, 6 }
 0x77d   :  { %v2933_v22 = vpop.f32.mrf.mxu1 }
 0x77e   :  { %v611_v23 = vadd.f32 %v609_v21, %v3534_v32 }
 0x780   :  { %3237 = vtanh.f32 %v611_v23  ;;  %v2650_v29 = vmul.f32 -1.442695, %v611_v23 }
 0x782   :  { %3239 = vpow2.f32 %v2650_v29 }
 0x78d   :  { %v3238_v28 = vpop.eup %3237 }
 0x78e   :  { %624 = vrot.lane.b32.xlu0 %v3238_v28, %s3387_s23 }
 0x78f   :  { %v3240_v31 = vpop.eup %3239 }
 0x790   :  { %v615_v33 = vadd.f32 1.0, %v3240_v31 }
 0x792   :  { %3241 = vrcp.f32 %v615_v33 }
 0x79f   :  { %v3242_v34 = vpop.eup %3241 }
 0x7a0   :  { %v622_v38 = vmul.f32 %v3242_v34, %v620_v37 }
 0x800   :  { %v625_v35 = vpop.permute.xlu0 %624 }
 0x801   :  { %v627_v36 = vmul.f32 %v3242_v34, %v625_v35 }
 0x803   :  { %629 = vrot.lane.b32.xlu1 %v627_v36, %s3388_s4 }
 0x875   :  { %v630_v39 = vpop.permute.xlu1 %629 }
 0x876   :  { %v3693_v40 = vadd.f32 %v630_v39, %v622_v38 }
 0x878   :  { %3243 = vtanh.f32 %v3693_v40  ;;  %v908_v38 = vrot.slane %v3693_v40, 6 }
 0x885   :  { %v3244_v41 = vpop.eup %3243 }
 0x886   :  { %635 = vrot.lane.b32.xlu0 %v3244_v41, %s3387_s23 }
 0x88a   :  { %644 = vrot.lane.b32.xlu0 %v643_v42, %s3387_s23 }
 0x8f8   :  { %v636_v43 = vpop.permute.xlu0 %635 }
 0x8f9   :  { %v638_v44 = vmul.f32 %v3242_v34, %v636_v43 }
 0x8fb   :  { %640 = vrot.lane.b32.xlu1 %v638_v44, %s3388_s4  ;;  %v821_v13 = vrot.slane %v638_v44, 2 }
 0x8fc   :  { %v645_v52 = vpop.permute.xlu0 %644 }
 0x96d   :  { %v641_v55 = vpop.permute.xlu1 %640 }
 0x96e   :  { %v647_v45 = vsel %vm149_vm4, %v641_v55, %v645_v52 }
 0x96f   :  { %v649_v56 = vrot.slane %v647_v45, 2 }
 0x971   :  { %2951 = vmatmul.mubr.msk.f32.vlgmr.msra.gmra.mxu0 %vm56_vm0, %v649_v56 }
 0x972   :  { %2976 = vmatpush3.msra.mxu0 %v3545_v46  ;;  %2991 = vmatprep.mubr.msk.f32.mxu0 %vm3386_vm3, %v3385_v14 }
 0x973   :  { %2977 = vmatprep.subr.mxu0 %v3385_v14 }
 0x974   :  { %2978 = vmatpush3.msra.mxu0 %v3550_v47 }
 0x975   :  { %2979 = vmatprep.subr.mxu0 %v3385_v14 }
 0x976   :  { %2980 = vmatpush3.msra.mxu0 %v3557_v48 }
 0x977   :  { %2981 = vmatprep.subr.mxu0 %v3385_v14 }
 0x978   :  { %2982 = vmatpush3.msra.mxu0 %v3564_v49 }
 0x979   :  { %2983 = vmatprep.subr.mxu0 %v3385_v14 }
 0x97a   :  { %2984 = vmatpush3.msra.mxu0 %v3571_v50 }
 0x97b   :  { %2985 = vmatprep.subr.mxu0 %v3385_v14 }
 0x97c   :  { %2986 = vmatpush3.msra.mxu0 %v3578_v51 }
 0x97d   :  { %2987 = vmatprep.subr.mxu0 %v3385_v14 }
 0x97e   :  { %2988 = vmatpush3.msra.mxu0 %v3586_v53 }
 0x97f   :  { %2989 = vmatprep.subr.mxu0 %v3385_v14 }
 0x980   :  { %2990 = vmatpush3.msra.mxu0 %v3595_v54 }
 0x981   :  { %3016 = vmatprep.subr.mxu0 %v3385_v14 }
 0xa31   :  { %v718_v57 = vpop.f32.mrf.mxu0 }
 0xa32   :  { %v719_v58 = vadd.f32 %v3626_v59, %v718_v57 }
 0xa33   :  { %v2952_v60 = vpop.f32.mrf.mxu0 }
 0xa34   :  { %3245 = vtanh.f32 %v719_v58  ;;  %v2652_v62 = vmul.f32 -1.442695, %v719_v58 }
 0xa36   :  { %3247 = vpow2.f32 %v2652_v62 }
 0xa41   :  { %v3246_v61 = vpop.eup %3245 }
 0xa42   :  { %731 = vrot.lane.b32.xlu1 %v3246_v61, %s3387_s23 }
 0xa43   :  { %v3248_v63 = vpop.eup %3247 }
 0xa44   :  { %v725_v0 = vadd.f32 1.0, %v3248_v63 }
 0xa46   :  { %3249 = vrcp.f32 %v725_v0 }
 0xa53   :  { %v3250_v1 = vpop.eup %3249 }
 0xa54   :  { %v729_v4 = vmul.f32 %v3250_v1, %v3631_v8 }
 0xab4   :  { %v732_v2 = vpop.permute.xlu1 %731 }
 0xab5   :  { %v734_v3 = vmul.f32 %v3250_v1, %v732_v2 }
 0xab7   :  { %736 = vrot.lane.b32.xlu0 %v734_v3, %s3388_s4 }
 0xb29   :  { %v737_v5 = vpop.permute.xlu0 %736 }
 0xb2a   :  { %v3723_v6 = vadd.f32 %v737_v5, %v729_v4 }
 0xb2c   :  { %3251 = vtanh.f32 %v3723_v6 }
 0xb39   :  { %v3252_v7 = vpop.eup %3251 }
 0xb3a   :  { %742 = vrot.lane.b32.xlu1 %v3252_v7, %s3387_s23 }
 0xb3e   :  { %822 = vrot.lane.b32.xlu1 %v821_v13, %s3388_s4 }
 0xbac   :  { %v743_v15 = vpop.permute.xlu1 %742 }
 0xbad   :  { %v745_v16 = vmul.f32 %v3250_v1, %v743_v15 }
 0xbaf   :  { %747 = vrot.lane.b32.xlu0 %v745_v16, %s3388_s4  ;;  %v931_v44 = vrot.slane %v745_v16, 4 }
 0xbb0   :  { %v823_v8 = vpop.permute.xlu1 %822 }
 0xc21   :  { %v748_v17 = vpop.permute.xlu0 %747 }
 0xc22   :  { %2962 = vmatmul.mubr.msk.f32.vlgmr.msra.gmra.mxu1 %vm149_vm4, %v748_v17 }
 0xc23   :  { %2965 = vmatpush3.msra.mxu1 %v3497_v24  ;;  %2972 = vmatprep.mubr.msk.f32.mxu1 %vm3386_vm3, %v3385_v14 }
 0xc24   :  { %2966 = vmatprep.subr.mxu1 %v3385_v14 }
 0xc25   :  { %2967 = vmatpush3.msra.mxu1 %v3504_v25 }
 0xc26   :  { %2968 = vmatprep.subr.mxu1 %v3385_v14 }
 0xc27   :  { %2969 = vmatpush3.msra.mxu1 %v3513_v26 }
 0xc28   :  { %2970 = vmatprep.subr.mxu1 %v3385_v14 }
 0xc29   :  { %2971 = vmatpush3.msra.mxu1 %v3520_v27 }
 0xc2a   :  { %2973 = vmatmul.mubr.msk.f32.vlgmr.msra.gmra.mxu1 %vm149_vm4, %v823_v8  ;;  %2994 = vmatprep.subr.mxu1 %v3385_v14 }
 0xc2b   :  { %2995 = vmatpush3.msra.mxu1 %v3637_v9  ;;  %3002 = vmatprep.mubr.msk.f32.mxu1 %vm3386_vm3, %v3385_v14 }
 0xc2c   :  { %2996 = vmatprep.subr.mxu1 %v3385_v14 }
 0xc2d   :  { %2997 = vmatpush3.msra.mxu1 %v3642_v10 }
 0xc2e   :  { %2998 = vmatprep.subr.mxu1 %v3385_v14 }
 0xc2f   :  { %2999 = vmatpush3.msra.mxu1 %v3649_v11 }
 0xc30   :  { %3000 = vmatprep.subr.mxu1 %v3385_v14 }
 0xc31   :  { %3001 = vmatpush3.msra.mxu1 %v3656_v12 }
 0xc32   :  { %3005 = vmatprep.subr.mxu1 %v3385_v14 }
 0xce2   :  { %v3751_v19 = vpop.f32.mrf.mxu1 }
 0xce4   :  { %v2963_v20 = vpop.f32.mrf.mxu1 }
 0xcea   :  { %v892_v21 = vpop.f32.mrf.mxu1 }
 0xceb   :  { %v897_v22 = vrot.slane %v892_v21, 4  ;;  %v3818_v21 = vld [vmem:[%s4246_s8] ss:$0 sm:$0xff] }
 0xcec   :  { %v2974_v23 = vpop.f32.mrf.mxu1 }
 0xced   :  { %v899_v28 = vadd.f32 %v897_v22, %v3534_v32  ;;  %v3822_v22 = vadd.f32 %v3818_v21, %v3751_v19  ;;  %v3826_v23 = vadd.f32 %v3818_v21, %v3687_v18 }
 0xcef   :  { %3253 = vtanh.f32 %v899_v28  ;;  %v2655_v31 = vmul.f32 -1.442695, %v899_v28 }
 0xcf1   :  { %3255 = vpow2.f32 %v2655_v31 }
 0xcfc   :  { %v3254_v29 = vpop.eup %3253 }
 0xcfd   :  { %912 = vrot.lane.b32.xlu0 %v3254_v29, %s3387_s23  ;;  %v2541_v29 = vmax.f32 %v3826_v23, %v3822_v22 }
 0xcfe   :  { %v3256_v33 = vpop.eup %3255 }
 0xcff   :  { %v903_v34 = vadd.f32 1.0, %v3256_v33 }
 0xd01   :  { %3257 = vrcp.f32 %v903_v34 }
 0xd0e   :  { %v3258_v35 = vpop.eup %3257 }
 0xd0f   :  { %v910_v39 = vmul.f32 %v3258_v35, %v908_v38 }
 0xd6f   :  { %v913_v36 = vpop.permute.xlu0 %912 }
 0xd70   :  { %v915_v37 = vmul.f32 %v3258_v35, %v913_v36 }
 0xd72   :  { %917 = vrot.lane.b32.xlu1 %v915_v37, %s3388_s4 }
 0xde4   :  { %v918_v41 = vpop.permute.xlu1 %917 }
 0xde5   :  { %v3757_v42 = vadd.f32 %v918_v41, %v910_v39 }
 0xde7   :  { %3259 = vtanh.f32 %v3757_v42 }
 0xdf4   :  { %v3260_v43 = vpop.eup %3259 }
 0xdf5   :  { %923 = vrot.lane.b32.xlu0 %v3260_v43, %s3387_s23 }
 0xdf9   :  { %932 = vrot.lane.b32.xlu0 %v931_v44, %s3387_s23 }
 0xe67   :  { %v924_v52 = vpop.permute.xlu0 %923 }
 0xe68   :  { %v926_v55 = vmul.f32 %v3258_v35, %v924_v52 }
 0xe6a   :  { %928 = vrot.lane.b32.xlu1 %v926_v55, %s3388_s4  ;;  %v1109_v16 = vrot.slane %v926_v55, 4  ;;  %v1196_v55 = vrot.slane %v3757_v42, 6 }
 0xe6b   :  { %v933_v45 = vpop.permute.xlu0 %932 }
 0xedc   :  { %v929_v56 = vpop.permute.xlu1 %928 }
 0xedd   :  { %v935_v40 = vsel %vm149_vm4, %v929_v56, %v933_v45 }
 0xede   :  { %v937_v57 = vrot.slane %v935_v40, 4 }
 0xee0   :  { %2992 = vmatmul.mubr.msk.f32.vlgmr.msra.gmra.mxu0 %vm56_vm0, %v937_v57 }
 0xee1   :  { %3017 = vmatpush3.msra.mxu0 %v3545_v46  ;;  %3032 = vmatprep.mubr.msk.f32.mxu0 %vm3386_vm3, %v3385_v14 }
 0xee2   :  { %3018 = vmatprep.subr.mxu0 %v3385_v14 }
 0xee3   :  { %3019 = vmatpush3.msra.mxu0 %v3550_v47 }
 0xee4   :  { %3020 = vmatprep.subr.mxu0 %v3385_v14 }
 0xee5   :  { %3021 = vmatpush3.msra.mxu0 %v3557_v48 }
 0xee6   :  { %3022 = vmatprep.subr.mxu0 %v3385_v14 }
 0xee7   :  { %3023 = vmatpush3.msra.mxu0 %v3564_v49 }
 0xee8   :  { %3024 = vmatprep.subr.mxu0 %v3385_v14 }
 0xee9   :  { %3025 = vmatpush3.msra.mxu0 %v3571_v50 }
 0xeea   :  { %3026 = vmatprep.subr.mxu0 %v3385_v14 }
 0xeeb   :  { %3027 = vmatpush3.msra.mxu0 %v3578_v51 }
 0xeec   :  { %3028 = vmatprep.subr.mxu0 %v3385_v14 }
 0xeed   :  { %3029 = vmatpush3.msra.mxu0 %v3586_v53 }
 0xeee   :  { %3030 = vmatprep.subr.mxu0 %v3385_v14 }
 0xeef   :  { %3031 = vmatpush3.msra.mxu0 %v3595_v54 }
 0xef0   :  { %3057 = vmatprep.subr.mxu0 %v3385_v14 }
 0xfa0   :  { %v1006_v58 = vpop.f32.mrf.mxu0 }
 0xfa1   :  { %v1007_v60 = vadd.f32 %v3626_v59, %v1006_v58 }
 0xfa2   :  { %v2993_v61 = vpop.f32.mrf.mxu0 }
 0xfa3   :  { %3261 = vtanh.f32 %v1007_v60  ;;  %v2657_v63 = vmul.f32 -1.442695, %v1007_v60 }
 0xfa5   :  { %3263 = vpow2.f32 %v2657_v63 }
 0xfb0   :  { %v3262_v62 = vpop.eup %3261 }
 0xfb1   :  { %1019 = vrot.lane.b32.xlu1 %v3262_v62, %s3387_s23 }
 0xfb2   :  { %v3264_v0 = vpop.eup %3263 }
 0xfb3   :  { %v1013_v1 = vadd.f32 1.0, %v3264_v0 }
 0xfb5   :  { %3265 = vrcp.f32 %v1013_v1 }
 0xfc2   :  { %v3266_v2 = vpop.eup %3265 }
 0xfc3   :  { %v1017_v5 = vmul.f32 %v3266_v2, %v3723_v6 }
0x1023   :  { %v1020_v3 = vpop.permute.xlu1 %1019 }
0x1024   :  { %v1022_v4 = vmul.f32 %v3266_v2, %v1020_v3 }
0x1026   :  { %1024 = vrot.lane.b32.xlu0 %v1022_v4, %s3388_s4 }
0x1098   :  { %v1025_v7 = vpop.permute.xlu0 %1024 }
0x1099   :  { %v3787_v13 = vadd.f32 %v1025_v7, %v1017_v5 }
0x109b   :  { %3267 = vtanh.f32 %v3787_v13 }
0x10a8   :  { %v3268_v15 = vpop.eup %3267 }
0x10a9   :  { %1030 = vrot.lane.b32.xlu1 %v3268_v15, %s3387_s23 }
0x10ad   :  { %1110 = vrot.lane.b32.xlu1 %v1109_v16, %s3388_s4 }
0x111b   :  { %v1031_v17 = vpop.permute.xlu1 %1030 }
0x111c   :  { %v1033_v8 = vmul.f32 %v3266_v2, %v1031_v17 }
0x111e   :  { %1035 = vrot.lane.b32.xlu0 %v1033_v8, %s3388_s4  ;;  %v1219_v57 = vrot.slane %v1033_v8, 2 }
0x111f   :  { %v1111_v6 = vpop.permute.xlu1 %1110 }
0x1190   :  { %v1036_v20 = vpop.permute.xlu0 %1035 }
0x1191   :  { %3003 = vmatmul.mubr.msk.f32.vlgmr.msra.gmra.mxu1 %vm149_vm4, %v1036_v20 }
0x1192   :  { %3006 = vmatpush3.msra.mxu1 %v3497_v24  ;;  %3013 = vmatprep.mubr.msk.f32.mxu1 %vm3386_vm3, %v3385_v14 }
0x1193   :  { %3007 = vmatprep.subr.mxu1 %v3385_v14 }
0x1194   :  { %3008 = vmatpush3.msra.mxu1 %v3504_v25 }
0x1195   :  { %3009 = vmatprep.subr.mxu1 %v3385_v14 }
0x1196   :  { %3010 = vmatpush3.msra.mxu1 %v3513_v26 }
0x1197   :  { %3011 = vmatprep.subr.mxu1 %v3385_v14 }
0x1198   :  { %3012 = vmatpush3.msra.mxu1 %v3520_v27 }
0x1199   :  { %3014 = vmatmul.mubr.msk.f32.vlgmr.msra.gmra.mxu1 %vm149_vm4, %v1111_v6  ;;  %3035 = vmatprep.subr.mxu1 %v3385_v14 }
0x119a   :  { %3036 = vmatpush3.msra.mxu1 %v3637_v9  ;;  %3043 = vmatprep.mubr.msk.f32.mxu1 %vm3386_vm3, %v3385_v14 }
0x119b   :  { %3037 = vmatprep.subr.mxu1 %v3385_v14 }
0x119c   :  { %3038 = vmatpush3.msra.mxu1 %v3642_v10 }
0x119d   :  { %3039 = vmatprep.subr.mxu1 %v3385_v14 }
0x119e   :  { %3040 = vmatpush3.msra.mxu1 %v3649_v11 }
0x119f   :  { %3041 = vmatprep.subr.mxu1 %v3385_v14 }
0x11a0   :  { %3042 = vmatpush3.msra.mxu1 %v3656_v12 }
0x11a1   :  { %3046 = vmatprep.subr.mxu1 %v3385_v14 }
0x1251   :  { %v1105_v28 = vpop.f32.mrf.mxu1 }
0x1252   :  { %v3831_v31 = vadd.f32 %v3818_v21, %v1105_v28 }
0x1253   :  { %v3004_v33 = vpop.f32.mrf.mxu1 }
0x1254   :  { %v3834_v34 = vmax.f32 %v2541_v29, %v3831_v31 }
0x1259   :  { %v1180_v35 = vpop.f32.mrf.mxu1 }
0x125a   :  { %v1185_v36 = vrot.slane %v1180_v35, 2 }
0x125b   :  { %v3015_v37 = vpop.f32.mrf.mxu1 }
0x125c   :  { %v1187_v19 = vadd.f32 %v1185_v36, %v3534_v32 }
0x125e   :  { %3269 = vtanh.f32 %v1187_v19  ;;  %v2660_v18 = vmul.f32 -1.442695, %v1187_v19 }
0x1260   :  { %3271 = vpow2.f32 %v2660_v18 }
0x126b   :  { %v3270_v38 = vpop.eup %3269 }
0x126c   :  { %1200 = vrot.lane.b32.xlu0 %v3270_v38, %s3387_s23 }
0x126d   :  { %v3272_v39 = vpop.eup %3271 }
0x126e   :  { %v1191_v41 = vadd.f32 1.0, %v3272_v39 }
0x1270   :  { %3273 = vrcp.f32 %v1191_v41 }
0x127d   :  { %v3274_v43 = vpop.eup %3273 }
0x127e   :  { %v1198_v45 = vmul.f32 %v3274_v43, %v1196_v55 }
0x12de   :  { %v1201_v44 = vpop.permute.xlu0 %1200 }
0x12df   :  { %v1203_v52 = vmul.f32 %v3274_v43, %v1201_v44 }
0x12e1   :  { %1205 = vrot.lane.b32.xlu1 %v1203_v52, %s3388_s4 }
0x1353   :  { %v1206_v56 = vpop.permute.xlu1 %1205 }
0x1354   :  { %v3840_v40 = vadd.f32 %v1206_v56, %v1198_v45 }
0x1356   :  { %3275 = vtanh.f32 %v3840_v40  ;;  %v1481_v45 = vrot.slane %v3840_v40, 6 }
0x1363   :  { %v3276_v32 = vpop.eup %3275 }
0x1364   :  { %1211 = vrot.lane.b32.xlu0 %v3276_v32, %s3387_s23 }
0x1368   :  { %1220 = vrot.lane.b32.xlu0 %v1219_v57, %s3387_s23 }
0x13d6   :  { %v1212_v58 = vpop.permute.xlu0 %1211 }
0x13d7   :  { %v1214_v60 = vmul.f32 %v3274_v43, %v1212_v58 }
0x13d9   :  { %1216 = vrot.lane.b32.xlu1 %v1214_v60, %s3388_s4  ;;  %v1397_v29 = vrot.slane %v1214_v60, 6 }
0x13da   :  { %v1221_v61 = vpop.permute.xlu0 %1220 }
0x144b   :  { %v1217_v62 = vpop.permute.xlu1 %1216 }
0x144c   :  { %v1223_v42 = vsel %vm149_vm4, %v1217_v62, %v1221_v61 }
0x144d   :  { %v1225_v63 = vrot.slane %v1223_v42, 6 }
0x144f   :  { %3033 = vmatmul.mubr.msk.f32.vlgmr.msra.gmra.mxu0 %vm56_vm0, %v1225_v63 }
0x1450   :  { %3058 = vmatpush3.msra.mxu0 %v3545_v46  ;;  %3073 = vmatprep.mubr.msk.f32.mxu0 %vm3386_vm3, %v3385_v14 }
0x1451   :  { %3059 = vmatprep.subr.mxu0 %v3385_v14 }
0x1452   :  { %3060 = vmatpush3.msra.mxu0 %v3550_v47 }
0x1453   :  { %3061 = vmatprep.subr.mxu0 %v3385_v14 }
0x1454   :  { %3062 = vmatpush3.msra.mxu0 %v3557_v48 }
0x1455   :  { %3063 = vmatprep.subr.mxu0 %v3385_v14 }
0x1456   :  { %3064 = vmatpush3.msra.mxu0 %v3564_v49 }
0x1457   :  { %3065 = vmatprep.subr.mxu0 %v3385_v14 }
0x1458   :  { %3066 = vmatpush3.msra.mxu0 %v3571_v50 }
0x1459   :  { %3067 = vmatprep.subr.mxu0 %v3385_v14 }
0x145a   :  { %3068 = vmatpush3.msra.mxu0 %v3578_v51 }
0x145b   :  { %3069 = vmatprep.subr.mxu0 %v3385_v14 }
0x145c   :  { %3070 = vmatpush3.msra.mxu0 %v3586_v53 }
0x145d   :  { %3071 = vmatprep.subr.mxu0 %v3385_v14 }
0x145e   :  { %3072 = vmatpush3.msra.mxu0 %v3595_v54 }
0x145f   :  { %3098 = vmatprep.subr.mxu0 %v3385_v14 }
0x150f   :  { %v1294_v0 = vpop.f32.mrf.mxu0 }
0x1510   :  { %v1295_v1 = vadd.f32 %v3626_v59, %v1294_v0 }
0x1511   :  { %v3034_v2 = vpop.f32.mrf.mxu0 }
0x1512   :  { %3277 = vtanh.f32 %v1295_v1  ;;  %v2662_v4 = vmul.f32 -1.442695, %v1295_v1 }
0x1514   :  { %3279 = vpow2.f32 %v2662_v4 }
0x151f   :  { %v3278_v3 = vpop.eup %3277 }
0x1520   :  { %1307 = vrot.lane.b32.xlu1 %v3278_v3, %s3387_s23 }
0x1521   :  { %v3280_v5 = vpop.eup %3279 }
0x1522   :  { %v1301_v7 = vadd.f32 1.0, %v3280_v5 }
0x1524   :  { %3281 = vrcp.f32 %v1301_v7 }
0x1531   :  { %v3282_v15 = vpop.eup %3281 }
0x1532   :  { %v1305_v8 = vmul.f32 %v3282_v15, %v3787_v13 }
0x1592   :  { %v1308_v16 = vpop.permute.xlu1 %1307 }
0x1593   :  { %v1310_v17 = vmul.f32 %v3282_v15, %v1308_v16  ;;  %v3955_v16 = vld [vmem:[%s4241_s3 + $0x10] sm:$0xff] }
0x1595   :  { %1312 = vrot.lane.b32.xlu0 %v1310_v17, %s3388_s4  ;;  %v3962_v17 = vld [vmem:[%s4241_s3 + $0x8] sm:$0xff] }
0x1607   :  { %v1313_v20 = vpop.permute.xlu0 %1312 }
0x1608   :  { %v3870_v6 = vadd.f32 %v1313_v20, %v1305_v8  ;;  %v3969_v8 = vld [vmem:[%s4241_s3] sm:$0xff] }
0x160a   :  { %3283 = vtanh.f32 %v3870_v6 }
0x1617   :  { %v3284_v28 = vpop.eup %3283 }
0x1618   :  { %1318 = vrot.lane.b32.xlu1 %v3284_v28, %s3387_s23 }
0x161c   :  { %1398 = vrot.lane.b32.xlu1 %v1397_v29, %s3388_s4 }
0x168a   :  { %v1319_v33 = vpop.permute.xlu1 %1318 }
0x168b   :  { %v1321_v35 = vmul.f32 %v3282_v15, %v1319_v33  ;;  %v3946_v15 = vld [vmem:[%s4241_s3 + $0x18] sm:$0xff]  ;;  %s3391_s3 = smov 96  }
0x168d   :  { %1323 = vrot.lane.b32.xlu0 %v1321_v35, %s3388_s4 }
0x168e   :  { %v1399_v13 = vpop.permute.xlu1 %1398 }
0x16ff   :  { %v1324_v36 = vpop.permute.xlu0 %1323 }
0x1700   :  { %3044 = vmatmul.mubr.msk.f32.vlgmr.msra.gmra.mxu1 %vm149_vm4, %v1324_v36 }
0x1701   :  { %3047 = vmatpush3.msra.mxu1 %v3497_v24  ;;  %3054 = vmatprep.mubr.msk.f32.mxu1 %vm3386_vm3, %v3385_v14 }
0x1702   :  { %3048 = vmatprep.subr.mxu1 %v3385_v14 }
0x1703   :  { %3049 = vmatpush3.msra.mxu1 %v3504_v25 }
0x1704   :  { %3050 = vmatprep.subr.mxu1 %v3385_v14 }
0x1705   :  { %3051 = vmatpush3.msra.mxu1 %v3513_v26 }
0x1706   :  { %3052 = vmatprep.subr.mxu1 %v3385_v14 }
0x1707   :  { %3053 = vmatpush3.msra.mxu1 %v3520_v27 }
0x1708   :  { %3055 = vmatmul.mubr.msk.f32.vlgmr.msra.gmra.mxu1 %vm149_vm4, %v1399_v13  ;;  %3076 = vmatprep.subr.mxu1 %v3385_v14 }
0x1709   :  { %3077 = vmatpush3.msra.mxu1 %v3637_v9  ;;  %3084 = vmatprep.mubr.msk.f32.mxu1 %vm3386_vm3, %v3385_v14 }
0x170a   :  { %3078 = vmatprep.subr.mxu1 %v3385_v14 }
0x170b   :  { %3079 = vmatpush3.msra.mxu1 %v3642_v10 }
0x170c   :  { %3080 = vmatprep.subr.mxu1 %v3385_v14 }
0x170d   :  { %3081 = vmatpush3.msra.mxu1 %v3649_v11 }
0x170e   :  { %3082 = vmatprep.subr.mxu1 %v3385_v14 }
0x170f   :  { %3083 = vmatpush3.msra.mxu1 %v3656_v12 }
0x1710   :  { %3087 = vmatprep.subr.mxu1 %v3385_v14 }
0x17c0   :  { %v1393_v24 = vpop.f32.mrf.mxu1 }
0x17c1   :  { %v3899_v25 = vadd.f32 %v3818_v21, %v1393_v24 }
0x17c2   :  { %v3045_v26 = vpop.f32.mrf.mxu1 }
0x17c3   :  { %v2543_v27 = vmax.f32 %v3834_v34, %v3899_v25 }
0x17c8   :  { %v1468_v37 = vpop.f32.mrf.mxu1 }
0x17c9   :  { %v1472_v19 = vadd.f32 %v1468_v37, %v3532_v30 }
0x17ca   :  { %v3056_v38 = vpop.f32.mrf.mxu1 }
0x17cb   :  { %3285 = vtanh.f32 %v1472_v19  ;;  %v2665_v39 = vmul.f32 -1.442695, %v1472_v19 }
0x17cd   :  { %3287 = vpow2.f32 %v2665_v39 }
0x17d8   :  { %v3286_v18 = vpop.eup %3285 }
0x17d9   :  { %1485 = vrot.lane.b32.xlu0 %v3286_v18, %s3387_s23 }
0x17da   :  { %v3288_v41 = vpop.eup %3287 }
0x17db   :  { %v1476_v43 = vadd.f32 1.0, %v3288_v41 }
0x17dd   :  { %3289 = vrcp.f32 %v1476_v43 }
0x17ea   :  { %v3290_v44 = vpop.eup %3289 }
0x17eb   :  { %v1483_v56 = vmul.f32 %v3290_v44, %v1481_v45 }
0x184b   :  { %v1486_v52 = vpop.permute.xlu0 %1485 }
0x184c   :  { %v1488_v55 = vmul.f32 %v3290_v44, %v1486_v52 }
0x184e   :  { %1490 = vrot.lane.b32.xlu1 %v1488_v55, %s3388_s4 }
0x18c0   :  { %v1491_v32 = vpop.permute.xlu1 %1490 }
0x18c1   :  { %v3907_v57 = vadd.f32 %v1491_v32, %v1483_v56  ;;  %v4008_v56 = vld [vmem:[%s4243_s5 + $0x38] sm:$0xff]  ;;  %v4017_v32 = vld [vmem:[%s4243_s5 + $0x30] sm:$0xff] }
0x18c3   :  { %3291 = vtanh.f32 %v3907_v57  ;;  %v1764_v34 = vrot.slane %v3907_v57, 6  ;;  %v4024_v57 = vld [vmem:[%s4243_s5 + $0x28] sm:$0xff] }
0x18d0   :  { %v3292_v58 = vpop.eup %3291 }
0x18d1   :  { %1496 = vrot.lane.b32.xlu0 %v3292_v58, %s3387_s23  ;;  %v4031_v58 = vld [vmem:[%s4243_s5 + $0x20] sm:$0xff] }
0x18d5   :  { %1504 = vrot.lane.b32.xlu0 %v1321_v35, %s3387_s23 }
0x1943   :  { %v1497_v60 = vpop.permute.xlu0 %1496 }
0x1944   :  { %v1499_v61 = vmul.f32 %v3290_v44, %v1497_v60  ;;  %v4038_v60 = vld [vmem:[%s4243_s5 + $0x18] sm:$0xff] }
0x1946   :  { %1501 = vrot.lane.b32.xlu1 %v1499_v61, %s3388_s4  ;;  %v4045_v61 = vld [vmem:[%s4243_s5 + $0x10] sm:$0xff] }
0x1947   :  { %v1505_v62 = vpop.permute.xlu0 %1504 }
0x19b8   :  { %v1502_v42 = vpop.permute.xlu1 %1501 }
0x19b9   :  { %v1507_v63 = vsel %vm149_vm4, %v1502_v42, %v1505_v62  ;;  %v4052_v62 = vld [vmem:[%s4243_s5 + $0x8] sm:$0xff] }
0x19ba   :  { %3074 = vmatmul.mubr.msk.f32.vlgmr.msra.gmra.mxu0 %vm56_vm0, %v1507_v63 }
0x19bb   :  { %3099 = vmatpush3.msra.mxu0 %v3545_v46  ;;  %3114 = vmatprep.mubr.msk.f32.mxu0 %vm3386_vm3, %v3385_v14 }
0x19bc   :  { %3100 = vmatprep.subr.mxu0 %v3385_v14 }
0x19bd   :  { %3101 = vmatpush3.msra.mxu0 %v3550_v47 }
0x19be   :  { %3102 = vmatprep.subr.mxu0 %v3385_v14 }
0x19bf   :  { %3103 = vmatpush3.msra.mxu0 %v3557_v48 }
0x19c0   :  { %3104 = vmatprep.subr.mxu0 %v3385_v14 }
0x19c1   :  { %3105 = vmatpush3.msra.mxu0 %v3564_v49 }
0x19c2   :  { %3106 = vmatprep.subr.mxu0 %v3385_v14 }
0x19c3   :  { %3107 = vmatpush3.msra.mxu0 %v3571_v50 }
0x19c4   :  { %3108 = vmatprep.subr.mxu0 %v3385_v14 }
0x19c5   :  { %3109 = vmatpush3.msra.mxu0 %v3578_v51 }
0x19c6   :  { %3110 = vmatprep.subr.mxu0 %v3385_v14 }
0x19c7   :  { %3111 = vmatpush3.msra.mxu0 %v3586_v53 }
0x19c8   :  { %3112 = vmatprep.subr.mxu0 %v3385_v14 }
0x19c9   :  { %3113 = vmatpush3.msra.mxu0 %v3595_v54 }
0x19ca   :  { %3139 = vmatprep.subr.mxu0 %v3385_v14 }
0x1a7a   :  { %v1577_v46 = vpop.f32.mrf.mxu0 }
0x1a7b   :  { %v1578_v47 = vadd.f32 %v3626_v59, %v1577_v46  ;;  %v4066_v46 = vld [vmem:[%s4244_s6] ss:$0 sm:$0xff] }
0x1a7c   :  { %v3075_v48 = vpop.f32.mrf.mxu0 }
0x1a7d   :  { %3293 = vtanh.f32 %v1578_v47  ;;  %v2667_v50 = vmul.f32 -1.442695, %v1578_v47 }
0x1a7f   :  { %3295 = vpow2.f32 %v2667_v50 }
0x1a8a   :  { %v3294_v49 = vpop.eup %3293 }
0x1a8b   :  { %1590 = vrot.lane.b32.xlu1 %v3294_v49, %s3387_s23 }
0x1a8c   :  { %v3296_v51 = vpop.eup %3295 }
0x1a8d   :  { %v1584_v40 = vadd.f32 1.0, %v3296_v51 }
0x1a8f   :  { %3297 = vrcp.f32 %v1584_v40 }
0x1a9c   :  { %v3298_v53 = vpop.eup %3297 }
0x1a9d   :  { %v1588_v54 = vmul.f32 %v3298_v53, %v3870_v6 }
0x1afd   :  { %v1591_v0 = vpop.permute.xlu1 %1590 }
0x1afe   :  { %v1593_v1 = vmul.f32 %v3298_v53, %v1591_v0 }
0x1b00   :  { %1595 = vrot.lane.b32.xlu0 %v1593_v1, %s3388_s4 }
0x1b72   :  { %v1596_v2 = vpop.permute.xlu0 %1595 }
0x1b73   :  { %v3937_v3 = vadd.f32 %v1596_v2, %v1588_v54 }
0x1b75   :  { %3299 = vtanh.f32 %v3937_v3 }
0x1b82   :  { %v3300_v59 = vpop.eup %3299 }
0x1b83   :  { %1601 = vrot.lane.b32.xlu1 %v3300_v59, %s3387_s23 }
0x1bf5   :  { %v1602_v4 = vpop.permute.xlu1 %1601 }
0x1bf6   :  { %v1604_v5 = vmul.f32 %v3298_v53, %v1602_v4 }
0x1bf8   :  { %1606 = vrot.lane.b32.xlu0 %v1604_v5, %s3388_s4  ;;  %v1787_v39 = vrot.slane %v1604_v5, 6 }
0x1c6a   :  { %v1607_v7 = vpop.permute.xlu0 %1606 }
0x1c6b   :  { %3085 = vmatmul.mubr.msk.f32.vlgmr.msra.gmra.mxu1 %vm149_vm4, %v1607_v7 }
0x1c6c   :  { %3088 = vmatpush3.msra.mxu1 %v3946_v15  ;;  %3095 = vmatprep.mubr.msk.f32.mxu1 %vm3386_vm3, %v3385_v14 }
0x1c6d   :  { %3089 = vmatprep.subr.mxu1 %v3385_v14 }
0x1c6e   :  { %3090 = vmatpush3.msra.mxu1 %v3955_v16 }
0x1c6f   :  { %3091 = vmatprep.subr.mxu1 %v3385_v14 }
0x1c70   :  { %3092 = vmatpush3.msra.mxu1 %v3962_v17 }
0x1c71   :  { %3093 = vmatprep.subr.mxu1 %v3385_v14 }
0x1c72   :  { %3094 = vmatpush3.msra.mxu1 %v3969_v8 }
0x1c73   :  { %3096 = vmatmul.mubr.msk.f32.vlgmr.msra.gmra.mxu1 %vm149_vm4, %v1502_v42  ;;  %3117 = vmatprep.subr.mxu1 %v3385_v14  ;;  %v4059_v42 = vld [vmem:[%s4243_s5] sm:$0xff] }
0x1c74   :  { %3118 = vmatpush3.msra.mxu1 %v3637_v9  ;;  %3125 = vmatprep.mubr.msk.f32.mxu1 %vm3386_vm3, %v3385_v14 }
0x1c75   :  { %3119 = vmatprep.subr.mxu1 %v3385_v14 }
0x1c76   :  { %3120 = vmatpush3.msra.mxu1 %v3642_v10 }
0x1c77   :  { %3121 = vmatprep.subr.mxu1 %v3385_v14 }
0x1c78   :  { %3122 = vmatpush3.msra.mxu1 %v3649_v11 }
0x1c79   :  { %3123 = vmatprep.subr.mxu1 %v3385_v14 }
0x1c7a   :  { %3124 = vmatpush3.msra.mxu1 %v3656_v12 }
0x1c7b   :  { %3128 = vmatprep.subr.mxu1 %v3385_v14 }
0x1d2b   :  { %v1676_v20 = vpop.f32.mrf.mxu1 }
0x1d2c   :  { %v3985_v9 = vadd.f32 %v3818_v21, %v1676_v20 }
0x1d2d   :  { %v3086_v6 = vpop.f32.mrf.mxu1 }
0x1d2e   :  { %v3991_v10 = vmax.f32 %v2543_v27, %v3985_v9 }
0x1d33   :  { %v1748_v28 = vpop.f32.mrf.mxu1 }
0x1d34   :  { %v1753_v29 = vrot.slane %v1748_v28, 6  ;;  %v4093_v28 = vld [vmem:[%s4245_s7 + $0x18] sm:$0xff] }
0x1d35   :  { %v3097_v11 = vpop.f32.mrf.mxu1 }
0x1d36   :  { %v1755_v33 = vadd.f32 %v1753_v29, %v3532_v30  ;;  %v4102_v29 = vld [vmem:[%s4245_s7 + $0x10] sm:$0xff]  ;;  %v4109_v11 = vld [vmem:[%s4245_s7 + $0x8] sm:$0xff] }
0x1d38   :  { %3301 = vtanh.f32 %v1755_v33  ;;  %v2670_v35 = vmul.f32 -1.442695, %v1755_v33  ;;  %v4116_v33 = vld [vmem:[%s4245_s7] sm:$0xff]  ;;  %s3389_s7 = smov 16  }
0x1d3a   :  { %3303 = vpow2.f32 %v2670_v35 }
0x1d45   :  { %v3302_v12 = vpop.eup %3301 }
0x1d46   :  { %1768 = vrot.lane.b32.xlu1 %v3302_v12, %s3387_s23 }
0x1d47   :  { %v3304_v36 = vpop.eup %3303 }
0x1d48   :  { %v1759_v13 = vadd.f32 1.0, %v3304_v36 }
0x1d4a   :  { %3305 = vrcp.f32 %v1759_v13 }
0x1d57   :  { %v3306_v24 = vpop.eup %3305 }
0x1d58   :  { %v1766_v27 = vmul.f32 %v3306_v24, %v1764_v34 }
0x1db8   :  { %v1769_v26 = vpop.permute.xlu1 %1768 }
0x1db9   :  { %v1771_v37 = vmul.f32 %v3306_v24, %v1769_v26 }
0x1dbb   :  { %1773 = vrot.lane.b32.xlu0 %v1771_v37, %s3388_s4 }
0x1e2d   :  { %v1774_v19 = vpop.permute.xlu0 %1773 }
0x1e2e   :  { %v3997_v38 = vadd.f32 %v1774_v19, %v1766_v27 }
0x1e30   :  { %3307 = vtanh.f32 %v3997_v38 }
0x1e3d   :  { %v3308_v18 = vpop.eup %3307 }
0x1e3e   :  { %1779 = vrot.lane.b32.xlu1 %v3308_v18, %s3387_s23 }
0x1e42   :  { %1788 = vrot.lane.b32.xlu1 %v1787_v39, %s3387_s23 }
0x1eb0   :  { %v1780_v41 = vpop.permute.xlu1 %1779 }
0x1eb1   :  { %v1782_v43 = vmul.f32 %v3306_v24, %v1780_v41 }
0x1eb3   :  { %1784 = vrot.lane.b32.xlu0 %v1782_v43, %s3388_s4  ;;  %v1965_v5 = vrot.slane %v1782_v43, 2 }
0x1eb4   :  { %v1789_v44 = vpop.permute.xlu1 %1788 }
0x1f25   :  { %v1785_v52 = vpop.permute.xlu0 %1784 }
0x1f26   :  { %v1791_v55 = vsel %vm149_vm4, %v1785_v52, %v1789_v44  ;;  %v2052_v52 = vrot.slane %v3997_v38, 6 }
0x1f27   :  { %v1793_v45 = vrot.slane %v1791_v55, 2 }
0x1f29   :  { %3115 = vmatmul.mubr.msk.f32.vlgmr.msra.gmra.mxu0 %vm56_vm0, %v1793_v45 }
0x1f2a   :  { %3140 = vmatpush3.msra.mxu0 %v4008_v56  ;;  %3155 = vmatprep.mubr.msk.f32.mxu0 %vm3386_vm3, %v3385_v14 }
0x1f2b   :  { %3141 = vmatprep.subr.mxu0 %v3385_v14 }
0x1f2c   :  { %3142 = vmatpush3.msra.mxu0 %v4017_v32 }
0x1f2d   :  { %3143 = vmatprep.subr.mxu0 %v3385_v14 }
0x1f2e   :  { %3144 = vmatpush3.msra.mxu0 %v4024_v57 }
0x1f2f   :  { %3145 = vmatprep.subr.mxu0 %v3385_v14 }
0x1f30   :  { %3146 = vmatpush3.msra.mxu0 %v4031_v58 }
0x1f31   :  { %3147 = vmatprep.subr.mxu0 %v3385_v14 }
0x1f32   :  { %3148 = vmatpush3.msra.mxu0 %v4038_v60 }
0x1f33   :  { %3149 = vmatprep.subr.mxu0 %v3385_v14 }
0x1f34   :  { %3150 = vmatpush3.msra.mxu0 %v4045_v61 }
0x1f35   :  { %3151 = vmatprep.subr.mxu0 %v3385_v14 }
0x1f36   :  { %3152 = vmatpush3.msra.mxu0 %v4052_v62 }
0x1f37   :  { %3153 = vmatprep.subr.mxu0 %v3385_v14 }
0x1f38   :  { %3154 = vmatpush3.msra.mxu0 %v4059_v42 }
0x1f39   :  { %3180 = vmatprep.subr.mxu0 %v3385_v14 }
0x1fe9   :  { %v1862_v63 = vpop.f32.mrf.mxu0 }
0x1fea   :  { %v1863_v47 = vadd.f32 %v4066_v46, %v1862_v63 }
0x1feb   :  { %v3116_v48 = vpop.f32.mrf.mxu0 }
0x1fec   :  { %3309 = vtanh.f32 %v1863_v47  ;;  %v2672_v50 = vmul.f32 -1.442695, %v1863_v47 }
0x1fee   :  { %3311 = vpow2.f32 %v2672_v50 }
0x1ff9   :  { %v3310_v49 = vpop.eup %3309 }
0x1ffa   :  { %1875 = vrot.lane.b32.xlu0 %v3310_v49, %s3387_s23 }
0x1ffb   :  { %v3312_v51 = vpop.eup %3311 }
0x1ffc   :  { %v1869_v40 = vadd.f32 1.0, %v3312_v51 }
0x1ffe   :  { %3313 = vrcp.f32 %v1869_v40 }
0x200b   :  { %v3314_v53 = vpop.eup %3313 }
0x200c   :  { %v1873_v54 = vmul.f32 %v3314_v53, %v3937_v3 }
0x206c   :  { %v1876_v0 = vpop.permute.xlu0 %1875 }
0x206d   :  { %v1878_v1 = vmul.f32 %v3314_v53, %v1876_v0 }
0x206f   :  { %1880 = vrot.lane.b32.xlu1 %v1878_v1, %s3388_s4 }
0x20e1   :  { %v1881_v2 = vpop.permute.xlu1 %1880 }
0x20e2   :  { %v4072_v59 = vadd.f32 %v1881_v2, %v1873_v54 }
0x20e4   :  { %3315 = vtanh.f32 %v4072_v59 }
0x20f1   :  { %v3316_v4 = vpop.eup %3315 }
0x20f2   :  { %1886 = vrot.lane.b32.xlu0 %v3316_v4, %s3387_s23 }
0x20f6   :  { %1966 = vrot.lane.b32.xlu0 %v1965_v5, %s3388_s4 }
0x2164   :  { %v1887_v7 = vpop.permute.xlu0 %1886 }
0x2165   :  { %v1889_v20 = vmul.f32 %v3314_v53, %v1887_v7 }
0x2167   :  { %1891 = vrot.lane.b32.xlu1 %v1889_v20, %s3388_s4  ;;  %v2075_v48 = vrot.slane %v1889_v20, 4 }
0x2168   :  { %v1967_v3 = vpop.permute.xlu0 %1966 }
0x21d9   :  { %v1892_v6 = vpop.permute.xlu1 %1891 }
0x21da   :  { %3126 = vmatmul.mubr.msk.f32.vlgmr.msra.gmra.mxu1 %vm149_vm4, %v1892_v6 }
0x21db   :  { %3129 = vmatpush3.msra.mxu1 %v3946_v15  ;;  %3136 = vmatprep.mubr.msk.f32.mxu1 %vm3386_vm3, %v3385_v14 }
0x21dc   :  { %3130 = vmatprep.subr.mxu1 %v3385_v14 }
0x21dd   :  { %3131 = vmatpush3.msra.mxu1 %v3955_v16 }
0x21de   :  { %3132 = vmatprep.subr.mxu1 %v3385_v14 }
0x21df   :  { %3133 = vmatpush3.msra.mxu1 %v3962_v17 }
0x21e0   :  { %3134 = vmatprep.subr.mxu1 %v3385_v14 }
0x21e1   :  { %3135 = vmatpush3.msra.mxu1 %v3969_v8 }
0x21e2   :  { %3137 = vmatmul.mubr.msk.f32.vlgmr.msra.gmra.mxu1 %vm149_vm4, %v1967_v3  ;;  %3158 = vmatprep.subr.mxu1 %v3385_v14 }
0x21e3   :  { %3159 = vmatpush3.msra.mxu1 %v4093_v28  ;;  %3166 = vmatprep.mubr.msk.f32.mxu1 %vm3386_vm3, %v3385_v14 }
0x21e4   :  { %3160 = vmatprep.subr.mxu1 %v3385_v14 }
0x21e5   :  { %3161 = vmatpush3.msra.mxu1 %v4102_v29 }
0x21e6   :  { %3162 = vmatprep.subr.mxu1 %v3385_v14 }
0x21e7   :  { %3163 = vmatpush3.msra.mxu1 %v4109_v11 }
0x21e8   :  { %3164 = vmatprep.subr.mxu1 %v3385_v14 }
0x21e9   :  { %3165 = vmatpush3.msra.mxu1 %v4116_v33 }
0x21ea   :  { %3169 = vmatprep.subr.mxu1 %v3385_v14 }
0x229a   :  { %v1961_v12 = vpop.f32.mrf.mxu1 }
0x229b   :  { %v4121_v35 = vadd.f32 %v3818_v21, %v1961_v12 }
0x229c   :  { %v3127_v36 = vpop.f32.mrf.mxu1 }
0x229d   :  { %v2545_v13 = vmax.f32 %v3991_v10, %v4121_v35 }
0x22a2   :  { %v2036_v24 = vpop.f32.mrf.mxu1 }
0x22a3   :  { %v2041_v26 = vrot.slane %v2036_v24, 4 }
0x22a4   :  { %v3138_v37 = vpop.f32.mrf.mxu1 }
0x22a5   :  { %v2043_v34 = vadd.f32 %v2041_v26, %v3532_v30 }
0x22a7   :  { %3317 = vtanh.f32 %v2043_v34  ;;  %v2675_v19 = vmul.f32 -1.442695, %v2043_v34 }
0x22a9   :  { %3319 = vpow2.f32 %v2675_v19 }
0x22b4   :  { %v3318_v27 = vpop.eup %3317 }
0x22b5   :  { %2056 = vrot.lane.b32.xlu1 %v3318_v27, %s3387_s23 }
0x22b6   :  { %v3320_v18 = vpop.eup %3319 }
0x22b7   :  { %v2047_v39 = vadd.f32 1.0, %v3320_v18 }
0x22b9   :  { %3321 = vrcp.f32 %v2047_v39 }
0x22c6   :  { %v3322_v41 = vpop.eup %3321 }
0x22c7   :  { %v2054_v55 = vmul.f32 %v3322_v41, %v2052_v52 }
0x2327   :  { %v2057_v43 = vpop.permute.xlu1 %2056 }
0x2328   :  { %v2059_v44 = vmul.f32 %v3322_v41, %v2057_v43 }
0x232a   :  { %2061 = vrot.lane.b32.xlu0 %v2059_v44, %s3388_s4 }
0x239c   :  { %v2062_v45 = vpop.permute.xlu0 %2061 }
0x239d   :  { %v4129_v63 = vadd.f32 %v2062_v45, %v2054_v55 }
0x239f   :  { %3323 = vtanh.f32 %v4129_v63  ;;  %v2340_v10 = vrot.slane %v4129_v63, 6 }
0x23ac   :  { %v3324_v47 = vpop.eup %3323 }
0x23ad   :  { %2067 = vrot.lane.b32.xlu1 %v3324_v47, %s3387_s23 }
0x23b1   :  { %2076 = vrot.lane.b32.xlu1 %v2075_v48, %s3387_s23 }
0x241f   :  { %v2068_v49 = vpop.permute.xlu1 %2067 }
0x2420   :  { %v2070_v50 = vmul.f32 %v3322_v41, %v2068_v49 }
0x2422   :  { %2072 = vrot.lane.b32.xlu0 %v2070_v50, %s3388_s4  ;;  %v2253_v7 = vrot.slane %v2070_v50, 4 }
0x2423   :  { %v2077_v51 = vpop.permute.xlu1 %2076 }
0x2494   :  { %v2073_v40 = vpop.permute.xlu0 %2072 }
0x2495   :  { %v2079_v38 = vsel %vm149_vm4, %v2073_v40, %v2077_v51 }
0x2496   :  { %v2081_v53 = vrot.slane %v2079_v38, 4 }
0x2498   :  { %3156 = vmatmul.mubr.msk.f32.vlgmr.msra.gmra.mxu0 %vm56_vm0, %v2081_v53 }
0x2499   :  { %3181 = vmatpush3.msra.mxu0 %v4008_v56  ;;  %3196 = vmatprep.mubr.msk.f32.mxu0 %vm3386_vm3, %v3385_v14 }
0x249a   :  { %3182 = vmatprep.subr.mxu0 %v3385_v14 }
0x249b   :  { %3183 = vmatpush3.msra.mxu0 %v4017_v32 }
0x249c   :  { %3184 = vmatprep.subr.mxu0 %v3385_v14 }
0x249d   :  { %3185 = vmatpush3.msra.mxu0 %v4024_v57 }
0x249e   :  { %3186 = vmatprep.subr.mxu0 %v3385_v14 }
0x249f   :  { %3187 = vmatpush3.msra.mxu0 %v4031_v58 }
0x24a0   :  { %3188 = vmatprep.subr.mxu0 %v3385_v14 }
0x24a1   :  { %3189 = vmatpush3.msra.mxu0 %v4038_v60 }
0x24a2   :  { %3190 = vmatprep.subr.mxu0 %v3385_v14 }
0x24a3   :  { %3191 = vmatpush3.msra.mxu0 %v4045_v61 }
0x24a4   :  { %3192 = vmatprep.subr.mxu0 %v3385_v14 }
0x24a5   :  { %3193 = vmatpush3.msra.mxu0 %v4052_v62 }
0x24a6   :  { %3194 = vmatprep.subr.mxu0 %v3385_v14 }
0x24a7   :  { %3195 = vmatpush3.msra.mxu0 %v4059_v42 }
0x2558   :  { %v2150_v56 = vpop.f32.mrf.mxu0 }
0x2559   :  { %v2151_v32 = vadd.f32 %v4066_v46, %v2150_v56 }
0x255a   :  { %v3157_v57 = vpop.f32.mrf.mxu0 }
0x255b   :  { %3325 = vtanh.f32 %v2151_v32  ;;  %v2677_v60 = vmul.f32 -1.442695, %v2151_v32 }
0x255d   :  { %3327 = vpow2.f32 %v2677_v60 }
0x2568   :  { %v3326_v58 = vpop.eup %3325 }
0x2569   :  { %2163 = vrot.lane.b32.xlu0 %v3326_v58, %s3387_s23 }
0x256a   :  { %v3328_v0 = vpop.eup %3327 }
0x256b   :  { %v2157_v61 = vadd.f32 1.0, %v3328_v0 }
0x256d   :  { %3329 = vrcp.f32 %v2157_v61 }
0x257a   :  { %v3330_v1 = vpop.eup %3329 }
0x257b   :  { %v2161_v42 = vmul.f32 %v3330_v1, %v4072_v59 }
0x25db   :  { %v2164_v54 = vpop.permute.xlu0 %2163 }
0x25dc   :  { %v2166_v62 = vmul.f32 %v3330_v1, %v2164_v54 }
0x25de   :  { %2168 = vrot.lane.b32.xlu1 %v2166_v62, %s3388_s4 }
0x2650   :  { %v2169_v2 = vpop.permute.xlu1 %2168 }
0x2651   :  { %v4158_v4 = vadd.f32 %v2169_v2, %v2161_v42 }
0x2653   :  { %3331 = vtanh.f32 %v4158_v4 }
0x2660   :  { %v3332_v5 = vpop.eup %3331 }
0x2661   :  { %2174 = vrot.lane.b32.xlu0 %v3332_v5, %s3387_s23 }
0x2665   :  { %2254 = vrot.lane.b32.xlu0 %v2253_v7, %s3388_s4 }
0x26d3   :  { %v2175_v20 = vpop.permute.xlu0 %2174 }
0x26d4   :  { %v2177_v6 = vmul.f32 %v3330_v1, %v2175_v20 }
0x26d6   :  { %2179 = vrot.lane.b32.xlu1 %v2177_v6, %s3388_s4  ;;  %v2363_v18 = vrot.slane %v2177_v6, 2 }
0x26d7   :  { %v2255_v59 = vpop.permute.xlu0 %2254 }
0x2748   :  { %v2180_v3 = vpop.permute.xlu1 %2179 }
0x2749   :  { %3167 = vmatmul.mubr.msk.f32.vlgmr.msra.gmra.mxu1 %vm149_vm4, %v2180_v3 }
0x274a   :  { %3170 = vmatpush3.msra.mxu1 %v3946_v15  ;;  %3177 = vmatprep.mubr.msk.f32.mxu1 %vm3386_vm3, %v3385_v14 }
0x274b   :  { %3171 = vmatprep.subr.mxu1 %v3385_v14 }
0x274c   :  { %3172 = vmatpush3.msra.mxu1 %v3955_v16 }
0x274d   :  { %3173 = vmatprep.subr.mxu1 %v3385_v14 }
0x274e   :  { %3174 = vmatpush3.msra.mxu1 %v3962_v17 }
0x274f   :  { %3175 = vmatprep.subr.mxu1 %v3385_v14 }
0x2750   :  { %3176 = vmatpush3.msra.mxu1 %v3969_v8 }
0x2751   :  { %3178 = vmatmul.mubr.msk.f32.vlgmr.msra.gmra.mxu1 %vm149_vm4, %v2255_v59  ;;  %3199 = vmatprep.subr.mxu1 %v3385_v14 }
0x2752   :  { %3200 = vmatpush3.msra.mxu1 %v4093_v28  ;;  %3207 = vmatprep.mubr.msk.f32.mxu1 %vm3386_vm3, %v3385_v14 }
0x2753   :  { %3201 = vmatprep.subr.mxu1 %v3385_v14 }
0x2754   :  { %3202 = vmatpush3.msra.mxu1 %v4102_v29 }
0x2755   :  { %3203 = vmatprep.subr.mxu1 %v3385_v14 }
0x2756   :  { %3204 = vmatpush3.msra.mxu1 %v4109_v11 }
0x2757   :  { %3205 = vmatprep.subr.mxu1 %v3385_v14 }
0x2758   :  { %3206 = vmatpush3.msra.mxu1 %v4116_v33 }
0x2809   :  { %v2249_v15 = vpop.f32.mrf.mxu1 }
0x280a   :  { %v4186_v16 = vadd.f32 %v3818_v21, %v2249_v15 }
0x280b   :  { %v3168_v17 = vpop.f32.mrf.mxu1 }
0x280c   :  { %v4192_v8 = vmax.f32 %v2545_v13, %v4186_v16 }
0x2811   :  { %v2324_v28 = vpop.f32.mrf.mxu1 }
0x2812   :  { %v2329_v29 = vrot.slane %v2324_v28, 2 }
0x2813   :  { %v3179_v12 = vpop.f32.mrf.mxu1 }
0x2814   :  { %v2331_v11 = vadd.f32 %v2329_v29, %v3532_v30 }
0x2816   :  { %3333 = vtanh.f32 %v2331_v11  ;;  %v2680_v33 = vmul.f32 -1.442695, %v2331_v11 }
0x2818   :  { %3335 = vpow2.f32 %v2680_v33 }
0x2823   :  { %v3334_v14 = vpop.eup %3333 }
0x2824   :  { %2344 = vrot.lane.b32.xlu1 %v3334_v14, %s3387_s23 }
0x2825   :  { %v3336_v36 = vpop.eup %3335 }
0x2826   :  { %v2335_v24 = vadd.f32 1.0, %v3336_v36 }
0x2828   :  { %3337 = vrcp.f32 %v2335_v24 }
0x2835   :  { %v3338_v26 = vpop.eup %3337 }
0x2836   :  { %v2342_v13 = vmul.f32 %v3338_v26, %v2340_v10 }
0x2896   :  { %v2345_v37 = vpop.permute.xlu1 %2344 }
0x2897   :  { %v2347_v34 = vmul.f32 %v3338_v26, %v2345_v37 }
0x2899   :  { %2349 = vrot.lane.b32.xlu0 %v2347_v34, %s3388_s4 }
0x290b   :  { %v2350_v27 = vpop.permute.xlu0 %2349 }
0x290c   :  { %v2352_v19 = vadd.f32 %v2350_v27, %v2342_v13 }
0x290e   :  { %3339 = vtanh.f32 %v2352_v19 }
0x291b   :  { %v3340_v30 = vpop.eup %3339 }
0x291c   :  { %2355 = vrot.lane.b32.xlu1 %v3340_v30, %s3387_s23 }
0x2920   :  { %2364 = vrot.lane.b32.xlu1 %v2363_v18, %s3387_s23 }
0x298e   :  { %v2356_v39 = vpop.permute.xlu1 %2355 }
0x298f   :  { %v2358_v41 = vmul.f32 %v3338_v26, %v2356_v39 }
0x2991   :  { %2360 = vrot.lane.b32.xlu0 %v2358_v41, %s3388_s4 }
0x2992   :  { %v2365_v43 = vpop.permute.xlu1 %2364 }
0x2a03   :  { %v2361_v44 = vpop.permute.xlu0 %2360 }
0x2a04   :  { %v2367_v52 = vsel %vm149_vm4, %v2361_v44, %v2365_v43 }
0x2a05   :  { %v2369_v55 = vrot.slane %v2367_v52, 6 }
0x2a07   :  { %3197 = vmatmul.mubr.msk.f32.vlgmr.msra.gmra.mxu0 %vm56_vm0, %v2369_v55 }
0x2ac7   :  { %v2438_v45 = vpop.f32.mrf.mxu0 }
0x2ac8   :  { %v2439_v63 = vadd.f32 %v4066_v46, %v2438_v45 }
0x2ac9   :  { %v3198_v47 = vpop.f32.mrf.mxu0 }
0x2aca   :  { %3341 = vtanh.f32 %v2439_v63  ;;  %v2682_v49 = vmul.f32 -1.442695, %v2439_v63 }
0x2acc   :  { %3343 = vpow2.f32 %v2682_v49 }
0x2ad7   :  { %v3342_v48 = vpop.eup %3341 }
0x2ad8   :  { %2451 = vrot.lane.b32.xlu0 %v3342_v48, %s3387_s23 }
0x2ad9   :  { %v3344_v50 = vpop.eup %3343 }
0x2ada   :  { %v2445_v51 = vadd.f32 1.0, %v3344_v50 }
0x2adc   :  { %3345 = vrcp.f32 %v2445_v51 }
0x2ae9   :  { %v3346_v40 = vpop.eup %3345 }
0x2aea   :  { %v2449_v56 = vmul.f32 %v3346_v40, %v4158_v4 }
0x2b4a   :  { %v2452_v38 = vpop.permute.xlu0 %2451 }
0x2b4b   :  { %v2454_v53 = vmul.f32 %v3346_v40, %v2452_v38 }
0x2b4d   :  { %2456 = vrot.lane.b32.xlu1 %v2454_v53, %s3388_s4 }
0x2bbf   :  { %v2457_v32 = vpop.permute.xlu1 %2456 }
0x2bc0   :  { %v2459_v57 = vadd.f32 %v2457_v32, %v2449_v56 }
0x2bc2   :  { %3347 = vtanh.f32 %v2459_v57 }
0x2bcf   :  { %v3348_v46 = vpop.eup %3347 }
0x2bd0   :  { %2462 = vrot.lane.b32.xlu0 %v3348_v46, %s3387_s23 }
0x2c42   :  { %v2463_v58 = vpop.permute.xlu0 %2462 }
0x2c43   :  { %v2465_v60 = vmul.f32 %v3346_v40, %v2463_v58 }
0x2c45   :  { %2467 = vrot.lane.b32.xlu1 %v2465_v60, %s3388_s4 }
0x2cb7   :  { %v2468_v0 = vpop.permute.xlu1 %2467 }
0x2cb8   :  { %3208 = vmatmul.mubr.msk.f32.vlgmr.msra.gmra.mxu1 %vm149_vm4, %v2468_v0 }
0x2d78   :  { %v2537_v61 = vpop.f32.mrf.mxu1 }
0x2d79   :  { %v4211_v1 = vadd.f32 %v3818_v21, %v2537_v61 }
0x2d7a   :  { %v3209_v54 = vpop.f32.mrf.mxu1 }
0x2d7b   :  { %v2547_v62 = vmax.f32 %v4192_v8, %v4211_v1 }
0x2d7d   :  { %v2548_v42 = vsub.f32 %v3826_v23, %v2547_v62  ;;  %v2552_v2 = vsub.f32 %v3822_v22, %v2547_v62  ;;  %v2556_v4 = vsub.f32 %v3831_v31, %v2547_v62  ;;  %v2560_v5 = vsub.f32 %v3899_v25, %v2547_v62 }
0x2d7e   :  { %v2564_v7 = vsub.f32 %v3985_v9, %v2547_v62  ;;  %v2568_v20 = vsub.f32 %v4121_v35, %v2547_v62  ;;  %v2572_v6 = vsub.f32 %v4186_v16, %v2547_v62  ;;  %v2576_v28 = vsub.f32 %v4211_v1, %v2547_v62 }
0x2d7f   :  { %v2549_v21 = vmul.f32 1.442695, %v2548_v42  ;;  %v2553_v3 = vmul.f32 1.442695, %v2552_v2  ;;  %v2557_v59 = vmul.f32 1.442695, %v2556_v4 }
0x2d80   :  { %v2561_v15 = vmul.f32 1.442695, %v2560_v5  ;;  %v2565_v17 = vmul.f32 1.442695, %v2564_v7  ;;  %v2569_v8 = vmul.f32 1.442695, %v2568_v20 }
0x2d81   :  { %3349 = vpow2.f32 %v2549_v21  ;;  %v2573_v29 = vmul.f32 1.442695, %v2572_v6  ;;  %v2577_v12 = vmul.f32 1.442695, %v2576_v28 }
0x2d82   :  { %3351 = vpow2.f32 %v2553_v3 }
0x2d83   :  { %3353 = vpow2.f32 %v2557_v59 }
0x2d84   :  { %3355 = vpow2.f32 %v2561_v15 }
0x2d85   :  { %3357 = vpow2.f32 %v2565_v17 }
0x2d86   :  { %3359 = vpow2.f32 %v2569_v8 }
0x2d87   :  { %3361 = vpow2.f32 %v2573_v29 }
0x2d88   :  { %3363 = vpow2.f32 %v2577_v12 }
0x2d8e   :  { %v3350_v11 = vpop.eup %3349 }
0x2d8f   :  { %v3352_v14 = vpop.eup %3351 }
0x2d90   :  { %v2555_v33 = vadd.f32 %v3352_v14, %v3350_v11  ;;  %v3354_v36 = vpop.eup %3353 }
0x2d91   :  { %v3356_v26 = vpop.eup %3355 }
0x2d92   :  { %v2559_v24 = vadd.f32 %v3354_v36, %v2555_v33  ;;  %v3358_v34 = vpop.eup %3357 }
0x2d93   :  { %v3360_v13 = vpop.eup %3359 }
0x2d94   :  { %v2563_v37 = vadd.f32 %v3356_v26, %v2559_v24  ;;  %v3362_v19 = vpop.eup %3361 }
0x2d95   :  { %v3364_v18 = vpop.eup %3363 }
0x2d96   :  { %v2567_v10 = vadd.f32 %v3358_v34, %v2563_v37 }
0x2d98   :  { %v2571_v27 = vadd.f32 %v3360_v13, %v2567_v10 }
0x2d9a   :  { %v2575_v30 = vadd.f32 %v3362_v19, %v2571_v27 }
0x2d9c   :  { %v2579_v39 = vadd.f32 %v3364_v18, %v2575_v30 }
0x2d9e   :  { %3365 = vlog2.f32 %v2579_v39 }
0x2dab   :  { %v3366_v41 = vpop.eup %3365 }
0x2dac   :  { %v2581_v43 = vmul.f32 0.6931472, %v3366_v41 }
0x2dae   :  { %v2582_v44 = vadd.f32 %v2581_v43, %v2547_v62 }
0x2db0   :  { %v2585_v52 = vsub.f32 %v3831_v31, %v2582_v44  ;;  %v2584_v55 = vsub.f32 %v3822_v22, %v2582_v44  ;;  %v2587_v45 = vsub.f32 %v3985_v9, %v2582_v44  ;;  %v2586_v63 = vsub.f32 %v3899_v25, %v2582_v44 }
0x2db1   :  { %v2589_v47 = vsub.f32 %v4186_v16, %v2582_v44  ;;  %v2588_v48 = vsub.f32 %v4121_v35, %v2582_v44  ;;  %v2590_v49 = vsub.f32 %v4211_v1, %v2582_v44  ;;  %v2583_v22 = vsub.f32 %v3826_v23, %v2582_v44 }
0x2db2   :  { %2596 = vrot.lane.b32.xlu1 %v2585_v52, %s3388_s4  ;;  %2592 = vrot.lane.b32.xlu0 %v2584_v55, %s3389_s7 }
0x2db6   :  { %2604 = vrot.lane.b32.xlu1 %v2587_v45, %s3387_s23  ;;  %2600 = vrot.lane.b32.xlu0 %v2586_v63, %s3390_s1 }
0x2dba   :  { %2612 = vrot.lane.b32.xlu1 %v2589_v47, %s3391_s3  ;;  %2608 = vrot.lane.b32.xlu0 %v2588_v48, %s3392_s13 }
0x2dbe   :  { %2616 = vrot.lane.b32.xlu0 %v2590_v49, %s3393_s14 }
0x2e24   :  { %v2597_v31 = vpop.permute.xlu1 %2596  ;;  %v2593_v25 = vpop.permute.xlu0 %2592 }
0x2e25   :  { %v2620_v9 = vsel %vm2619_vm5, %v2583_v22, %v2593_v25 }
0x2e26   :  { %v2621_v50 = vsel %vm149_vm4, %v2620_v9, %v2597_v31 }
0x2e28   :  { %v2605_v35 = vpop.permute.xlu1 %2604  ;;  %v2601_v16 = vpop.permute.xlu0 %2600 }
0x2e29   :  { %v2623_v51 = vsel %vm2622_vm6, %v2621_v50, %v2601_v16 }
0x2e2a   :  { %v2624_v38 = vsel %vm56_vm0, %v2623_v51, %v2605_v35 }
0x2e2c   :  { %v2609_v40 = vpop.permute.xlu0 %2608  ;;  %v2613_v53 = vpop.permute.xlu1 %2612 }
0x2e2d   :  { %v2626_v56 = vsel %vm2625_vm7, %v2624_v38, %v2609_v40 }
0x2e2e   :  { %v2628_v57 = vsel %vm2627_vm8, %v2626_v56, %v2613_v53 }
0x2e30   :  { %v2617_v32 = vpop.permute.xlu0 %2616 }
0x2e31   :  { %v2630_v23 = vsel %vm2629_vm9, %v2628_v57, %v2617_v32 }
0x2e32   :  { %2631 = vst [vmem:[%s4247_s9] sm:$0x3] %v2630_v23 }

</bundles_post_ra>
